<compile_context>
chip_gen: v6e
topology: v6e:2x2x1
jax: 0.10.0
libtpu: 0.0.40
codegen_flags: <defaults>
</compile_context>

<pallas_src>
import functools

import jax
import jax.numpy as jnp
from jax import lax
from jax.experimental import pallas as pl
from jax.experimental.pallas import tpu as pltpu


def _architecture_kernel(x_ref, gamma_ref, beta_ref,
                         w1t_ref, b1_ref,
                         w2iht_ref, bias2_ref, whht_ref,
                         out_ref,
                         hc_s, h1_s, u_s, h2_s,
                         *, d_true, use_bf16, unroll):
    # x_ref: (Tc, Bb, Dp) time-major, lane-padded block
    tc, bb, dp = x_ref.shape
    cdt = jnp.bfloat16 if use_bf16 else jnp.float32
    inv_d = 1.0 / d_true

    # Reset the recurrent carry at the start of each batch block's T sweep.
    @pl.when(pl.program_id(1) == 0)
    def _():
        hc_s[...] = jnp.zeros_like(hc_s)

    x2 = x_ref[...].reshape(tc * bb, dp)

    # --- LayerNorm(d_model, eps=1e-12), masked to the true d_model (the last
    #     dim is zero-padded up to a lane-dense multiple of 128) ---
    col = lax.broadcasted_iota(jnp.int32, (1, dp), 1)
    mask = (col < d_true).astype(jnp.float32)
    mu = jnp.sum(x2, axis=-1, keepdims=True) * inv_d      # pad cols are zero
    xc = (x2 - mu) * mask
    var = jnp.sum(xc * xc, axis=-1, keepdims=True) * inv_d
    ln = xc * lax.rsqrt(var + 1e-12) * gamma_ref[...] + beta_ref[...]
    ln_c = ln.astype(cdt)

    # --- branch 1: SiLU(w_1(LN(x))) ---
    z1 = jnp.dot(ln_c, w1t_ref[...].astype(cdt),
                 preferred_element_type=jnp.float32) + b1_ref[...]
    h1_s[...] = (z1 * jax.nn.sigmoid(z1)).reshape(tc, bb, dp)

    # --- branch 2: fused LSTM input projection (w_2 folded into W_ih and all
    #     biases pre-combined on the host) — one big MXU matmul, outside the
    #     serial scan ---
    u_s[...] = (jnp.dot(ln_c, w2iht_ref[...].astype(cdt),
                        preferred_element_type=jnp.float32)
                + bias2_ref[...]).reshape(tc, bb, 4 * dp)

    whht = whht_ref[...].astype(cdt)                       # (Dp, 4Dp)

    # --- xlstm_block: batched LSTM scan over the time chunk.  Gates were
    #     reordered on the host to (i,f,o,g) so sigmoid covers [:3Dp] and tanh
    #     only [3Dp:] (halves EUP work on the serial path).
    # TODO(synk): true xLSTM (sLSTM/mLSTM) internals are an injected dependency
    # in the PyTorch model; a standard LSTM cell is the concrete stand-in.
    # TODO(synk): if still latency-bound at small D, split the batch block into
    # 2 interleaved independent sub-chains to hide MXU/EUP FIFO latency.
    def step(t, carry):
        h, c = carry                                       # (Bb, Dp) each
        gates = u_s[t] + jnp.dot(h.astype(cdt), whht,
                                 preferred_element_type=jnp.float32)
        sg = jax.nn.sigmoid(gates[:, :3 * dp])             # i, f, o
        g_g = jnp.tanh(gates[:, 3 * dp:])                  # g
        i_g = sg[:, 0 * dp:1 * dp]
        f_g = sg[:, 1 * dp:2 * dp]
        o_g = sg[:, 2 * dp:3 * dp]
        c_new = f_g * c + i_g * g_g
        h_new = o_g * jnp.tanh(c_new)
        h2_s[t] = h_new
        return (h_new, c_new)

    h_f, c_f = lax.fori_loop(0, tc, step, (hc_s[0], hc_s[1]), unroll=unroll)
    hc_s[0] = h_f
    hc_s[1] = c_f

    # --- dropout(h2 * h1) + x  (dropout = identity in eval mode); one
    #     vectorized lane-dense block store outside the serial loop ---
    # TODO(synk): training-mode dropout would need pltpu.prng_seed/random_bits.
    out_ref[...] = h2_s[...] * h1_s[...] + x_ref[...]


def _largest_divisor(n, cap, multiple_of=1):
    cap = max(1, min(cap, n))
    for d in range(cap, 0, -1):
        if n % d == 0 and (d % multiple_of == 0 or d == n):
            return d
    return n


def architecture_forward(x, params, *, block_b=None, block_t=None,
                         use_bf16_matmul=False):
    """params = (gamma, beta, w1, b1, w2, b2, wih, whh, bih, bhh), PyTorch
    layouts with LSTM gate order (i, f, g, o)."""
    gamma, beta, w1, b1, w2, b2, wih, whh, bih, bhh = params
    B, T, D = x.shape

    # lane-dense padding of d_model to a multiple of 128
    Dp = ((D + 127) // 128) * 128
    pad = Dp - D

    # Batch block: as large as VMEM allows (MXU row utilization in the per-step
    # h @ whh^T matmul + fewer sequential grid trips).  NOTE: on v7x prefer
    # B/block_b to be a multiple of 2 so both TensorCores get work.
    if block_b is None:
        block_b = _largest_divisor(B, 256, multiple_of=8)
    assert B % block_b == 0
    # Time chunk: bounds the (Tc, Bb, 4*Dp) gate scratch in VMEM; h/c carry
    # persists across chunks via scratch + the "arbitrary" grid axis.
    if block_t is None:
        block_t = _largest_divisor(T, 32)
    assert T % block_t == 0
    nb, nt = B // block_b, T // block_t

    hp = lax.Precision.HIGHEST
    order = (0, 1, 3, 2)   # PyTorch gate order (i,f,g,o) -> kernel (i,f,o,g)

    def gate_blocks(w):
        blocks = jnp.split(w, 4, axis=0)
        return [blocks[k] for k in order]

    def pad_gate_mat(w):   # (4D, D) -> (4Dp, Dp), per-gate zero padding
        return jnp.concatenate(
            [jnp.pad(blk, ((0, pad), (0, pad))) for blk in gate_blocks(w)],
            axis=0)

    def pad_gate_vec(v):   # (4D,) -> (4Dp,)
        return jnp.concatenate(
            [jnp.pad(blk, (0, pad)) for blk in gate_blocks(v)], axis=0)

    # Host-side weight prep (once): pre-transpose, fuse w_2 into the LSTM input
    # projection, pre-combine biases, reorder gates, zero-pad to Dp.
    gamma_p = jnp.pad(gamma, (0, pad)).reshape(1, Dp)
    beta_p = jnp.pad(beta, (0, pad)).reshape(1, Dp)
    w1t_p = jnp.pad(w1, ((0, pad), (0, pad))).T                     # (Dp, Dp)
    b1_p = jnp.pad(b1, (0, pad)).reshape(1, Dp)
    w2ih = jnp.dot(wih, w2, precision=hp)                           # (4D, D)
    w2iht_p = pad_gate_mat(w2ih).T                                  # (Dp, 4Dp)
    bias2_p = pad_gate_vec(jnp.dot(wih, b2, precision=hp)
                           + bih + bhh).reshape(1, 4 * Dp)
    whht_p = pad_gate_mat(whh).T                                    # (Dp, 4Dp)

    # Time-major, lane-padded input (layout plumbing only).
    xt = jnp.swapaxes(jnp.pad(x, ((0, 0), (0, 0), (0, pad))), 0, 1)  # (T,B,Dp)

    # Explicit VMEM budget (v5e scoped default is 16 MiB; v7x physical 64 MiB).
    fb = 4
    blk = block_t * block_b * Dp * fb
    wbytes = (Dp * Dp + 2 * Dp * 4 * Dp + 8 * Dp) * fb
    scratch = (2 * block_t * block_b * Dp + block_t * block_b * 4 * Dp
               + 2 * block_b * Dp) * fb
    vmem_est = 4 * blk + 2 * wbytes + scratch          # 2x-buffered x/out + wts
    vmem_limit = int(min(max(2 * vmem_est, 16 << 20), 64 << 20))

    kernel = functools.partial(_architecture_kernel, d_true=D,
                               use_bf16=use_bf16_matmul,
                               unroll=min(block_t, 8))

    out_t = pl.pallas_call(
        kernel,
        out_shape=jax.ShapeDtypeStruct((T, B, Dp), jnp.float32),
        grid=(nb, nt),
        in_specs=[
            pl.BlockSpec((block_t, block_b, Dp), lambda b, t: (t, b, 0)),  # x
            pl.BlockSpec((1, Dp), lambda b, t: (0, 0)),           # gamma
            pl.BlockSpec((1, Dp), lambda b, t: (0, 0)),           # beta
            pl.BlockSpec((Dp, Dp), lambda b, t: (0, 0)),          # w1^T
            pl.BlockSpec((1, Dp), lambda b, t: (0, 0)),           # b1
            pl.BlockSpec((Dp, 4 * Dp), lambda b, t: (0, 0)),      # (wih@w2)^T
            pl.BlockSpec((1, 4 * Dp), lambda b, t: (0, 0)),       # fused bias
            pl.BlockSpec((Dp, 4 * Dp), lambda b, t: (0, 0)),      # whh^T
        ],
        out_specs=pl.BlockSpec((block_t, block_b, Dp), lambda b, t: (t, b, 0)),
        scratch_shapes=[
            pltpu.VMEM((2, block_b, Dp), jnp.float32),            # h,c carry
            pltpu.VMEM((block_t, block_b, Dp), jnp.float32),      # h1 (SiLU)
            pltpu.VMEM((block_t, block_b, 4 * Dp), jnp.float32),  # gate pre-proj
            pltpu.VMEM((block_t, block_b, Dp), jnp.float32),      # h2 (LSTM out)
        ],
        compiler_params=pltpu.CompilerParams(
            dimension_semantics=("parallel", "arbitrary"),
            vmem_limit_bytes=vmem_limit),
    )(xt, gamma_p, beta_p, w1t_p, b1_p, w2iht_p, bias2_p, whht_p)

    return jnp.swapaxes(out_t, 0, 1)[..., :D]               # back to (B, T, D)


def reference_forward(x, params):
    """Pure-JAX reference (matches PyTorch eval-mode semantics)."""
    gamma, beta, w1, b1, w2, b2, wih, whh, bih, bhh = params
    hp = lax.Precision.HIGHEST
    mu = x.mean(-1, keepdims=True)
    var = ((x - mu) ** 2).mean(-1, keepdims=True)
    ln = (x - mu) / jnp.sqrt(var + 1e-12) * gamma + beta
    z1 = jnp.dot(ln, w1.T, precision=hp) + b1
    h1 = z1 * jax.nn.sigmoid(z1)
    u = jnp.dot(ln, w2.T, precision=hp) + b2
    B, T, D = x.shape

    def cell(carry, u_t):
        h, c = carry
        gates = (jnp.dot(u_t, wih.T, precision=hp)
                 + jnp.dot(h, whh.T, precision=hp) + bih + bhh)
        i, f, g, o = jnp.split(gates, 4, axis=-1)
        c = jax.nn.sigmoid(f) * c + jax.nn.sigmoid(i) * jnp.tanh(g)
        h = jax.nn.sigmoid(o) * jnp.tanh(c)
        return (h, c), h

    h0 = jnp.zeros((B, D), x.dtype)
    c0 = jnp.zeros((B, D), x.dtype)
    _, hs = lax.scan(cell, (h0, c0), jnp.swapaxes(u, 0, 1))
    h2 = jnp.swapaxes(hs, 0, 1)
    return h2 * h1 + x


if __name__ == "__main__":
    B, T, D = 2, 8, 32
    key = jax.random.PRNGKey(0)
    keys = jax.random.split(key, 10)

    scale = 0.1
    x = jax.random.normal(keys[0], (B, T, D), jnp.float32)

    gamma = jnp.ones((D,), jnp.float32) + 0.01 * jax.random.normal(keys[1], (D,))
    beta = 0.01 * jax.random.normal(keys[2], (D,), jnp.float32)
    w1 = scale * jax.random.normal(keys[3], (D, D), jnp.float32)
    b1 = scale * jax.random.normal(keys[4], (D,), jnp.float32)
    w2 = scale * jax.random.normal(keys[5], (D, D), jnp.float32)
    b2 = scale * jax.random.normal(keys[6], (D,), jnp.float32)
    wih = scale * jax.random.normal(keys[7], (4 * D, D), jnp.float32)
    whh = scale * jax.random.normal(keys[8], (4 * D, D), jnp.float32)
    bih = scale * jax.random.normal(keys[9], (4 * D,), jnp.float32)
    bhh = jnp.zeros((4 * D,), jnp.float32)

    params = (gamma, beta, w1, b1, w2, b2, wih, whh, bih, bhh)

    out = architecture_forward(x, params)
    out = jax.block_until_ready(out)

    ref = reference_forward(x, params)
    assert out.shape == (B, T, D)
    # Tolerance loosened vs. pure-f32 exactness: host-side (wih@w2) fusion,
    # gate reordering and lane-padding change the f32 rounding order.
    assert jnp.allclose(out, ref, atol=2e-4, rtol=2e-4), (
        f"max abs err = {jnp.max(jnp.abs(out - ref))}")
    print("KERNEL_OK")
</pallas_src>

<mosaic_0001>
module attributes {stable_mosaic.version = 11 : i64} {
  func.func @_architecture_kernel(%arg0: i32, %arg1: i32, %arg2: memref<8x2x128xf32, #tpu.memory_space<vmem>>, %arg3: memref<1x128xf32, #tpu.memory_space<vmem>>, %arg4: memref<1x128xf32, #tpu.memory_space<vmem>>, %arg5: memref<128x128xf32, #tpu.memory_space<vmem>>, %arg6: memref<1x128xf32, #tpu.memory_space<vmem>>, %arg7: memref<128x512xf32, #tpu.memory_space<vmem>>, %arg8: memref<1x512xf32, #tpu.memory_space<vmem>>, %arg9: memref<128x512xf32, #tpu.memory_space<vmem>>, %arg10: memref<8x2x128xf32, #tpu.memory_space<vmem>>, %arg11: memref<2x2x128xf32, #tpu.memory_space<vmem>>, %arg12: memref<8x2x128xf32, #tpu.memory_space<vmem>>, %arg13: memref<8x2x512xf32, #tpu.memory_space<vmem>>, %arg14: memref<8x2x128xf32, #tpu.memory_space<vmem>>) attributes {dimension_semantics = [#tpu.dimension_semantics<parallel>, #tpu.dimension_semantics<arbitrary>], iteration_bounds = array<i64: 1, 1>, scalar_prefetch = 0 : i64, scratch_operands = 4 : i64, tpu.core_type = #tpu.core_type<tc>, window_params = [{transform_indices = @transform_0, window_bounds = array<i64: 8, 2, 128>}, {pipeline_mode = #tpu.pipeline_mode<synchronous>, transform_indices = @transform_1, window_bounds = array<i64: 1, 128>}, {pipeline_mode = #tpu.pipeline_mode<synchronous>, transform_indices = @transform_2, window_bounds = array<i64: 1, 128>}, {pipeline_mode = #tpu.pipeline_mode<synchronous>, transform_indices = @transform_3, window_bounds = array<i64: 128, 128>}, {pipeline_mode = #tpu.pipeline_mode<synchronous>, transform_indices = @transform_4, window_bounds = array<i64: 1, 128>}, {pipeline_mode = #tpu.pipeline_mode<synchronous>, transform_indices = @transform_5, window_bounds = array<i64: 128, 512>}, {pipeline_mode = #tpu.pipeline_mode<synchronous>, transform_indices = @transform_6, window_bounds = array<i64: 1, 512>}, {pipeline_mode = #tpu.pipeline_mode<synchronous>, transform_indices = @transform_7, window_bounds = array<i64: 128, 512>}, {transform_indices = @transform_8, window_bounds = array<i64: 8, 2, 128>}]} {
    %c0_i32 = arith.constant 0 : i32
    %0 = arith.cmpi eq, %arg1, %c0_i32 : i32
    %1 = arith.extui %0 : i1 to i32
    %c0_i32_0 = arith.constant 0 : i32
    %2 = arith.cmpi ne, %1, %c0_i32_0 : i32
    scf.if %2 {
      %cst_102 = arith.constant 0.000000e+00 : f32
      %271 = vector.broadcast %cst_102 : f32 to vector<2x2x128xf32>
      %c0_103 = arith.constant 0 : index
      %c0_104 = arith.constant 0 : index
      %c0_105 = arith.constant 0 : index
      %272 = vector.load %arg11[%c0_103, %c0_104, %c0_105] : memref<2x2x128xf32, #tpu.memory_space<vmem>>, vector<2x2x128xf32>
      tpu.vector_store %arg11[%c0_103, %c0_104, %c0_105], %271 {strides = array<i32>} : memref<2x2x128xf32, #tpu.memory_space<vmem>>, vector<2x2x128xf32>,
    } else {
    }
    %c0 = arith.constant 0 : index
    %c0_1 = arith.constant 0 : index
    %c0_2 = arith.constant 0 : index
    %3 = vector.load %arg2[%c0, %c0_1, %c0_2] : memref<8x2x128xf32, #tpu.memory_space<vmem>>, vector<8x2x128xf32>
    %4 = vector.shape_cast %3 : vector<8x2x128xf32> to vector<16x128xf32>
    %5 = tpu.iota {dimensions = array<i32: 1>} : vector<1x128xi32>
    %c32_i32 = arith.constant 32 : i32
    %6 = vector.broadcast %c32_i32 : i32 to vector<1x128xi32>
    %7 = arith.cmpi slt, %5, %6 : vector<1x128xi32>
    %8 = arith.extui %7 : vector<1x128xi1> to vector<1x128xi32>
    %9 = arith.sitofp %8 : vector<1x128xi32> to vector<1x128xf32>
    %cst = arith.constant dense<0.000000e+00> : vector<16xf32>
    %10 = vector.multi_reduction <add>, %4, %cst [1] : vector<16x128xf32> to vector<16xf32>
    %11 = vector.shape_cast %10 : vector<16xf32> to vector<16x1xf32>
    %cst_3 = arith.constant 3.125000e-02 : f32
    %12 = vector.broadcast %cst_3 : f32 to vector<16x1xf32>
    %13 = arith.mulf %11, %12 : vector<16x1xf32>
    %14 = vector.broadcast %13 : vector<16x1xf32> to vector<16x128xf32>
    %15 = arith.subf %4, %14 : vector<16x128xf32>
    %16 = vector.broadcast %9 : vector<1x128xf32> to vector<16x128xf32>
    %17 = arith.mulf %15, %16 : vector<16x128xf32>
    %18 = arith.mulf %17, %17 : vector<16x128xf32>
    %cst_4 = arith.constant dense<0.000000e+00> : vector<16xf32>
    %19 = vector.multi_reduction <add>, %18, %cst_4 [1] : vector<16x128xf32> to vector<16xf32>
    %20 = vector.shape_cast %19 : vector<16xf32> to vector<16x1xf32>
    %cst_5 = arith.constant 3.125000e-02 : f32
    %21 = vector.broadcast %cst_5 : f32 to vector<16x1xf32>
    %22 = arith.mulf %20, %21 : vector<16x1xf32>
    %cst_6 = arith.constant 9.99999996E-13 : f32
    %23 = vector.broadcast %cst_6 : f32 to vector<16x1xf32>
    %24 = arith.addf %22, %23 : vector<16x1xf32>
    %25 = math.rsqrt %24 : vector<16x1xf32>
    %26 = vector.broadcast %25 : vector<16x1xf32> to vector<16x128xf32>
    %27 = arith.mulf %17, %26 : vector<16x128xf32>
    %c0_7 = arith.constant 0 : index
    %c0_8 = arith.constant 0 : index
    %28 = vector.load %arg3[%c0_7, %c0_8] : memref<1x128xf32, #tpu.memory_space<vmem>>, vector<1x128xf32>
    %29 = vector.broadcast %28 : vector<1x128xf32> to vector<16x128xf32>
    %30 = arith.mulf %27, %29 : vector<16x128xf32>
    %c0_9 = arith.constant 0 : index
    %c0_10 = arith.constant 0 : index
    %31 = vector.load %arg4[%c0_9, %c0_10] : memref<1x128xf32, #tpu.memory_space<vmem>>, vector<1x128xf32>
    %32 = vector.broadcast %31 : vector<1x128xf32> to vector<16x128xf32>
    %33 = arith.addf %30, %32 : vector<16x128xf32>
    %c0_11 = arith.constant 0 : index
    %c0_12 = arith.constant 0 : index
    %34 = vector.load %arg5[%c0_11, %c0_12] : memref<128x128xf32, #tpu.memory_space<vmem>>, vector<128x128xf32>
    %cst_13 = arith.constant dense<0.000000e+00> : vector<16x128xf32>
    %35 = tpu.matmul %33, %34, %cst_13 {dimension_numbers = #tpu.dot_dimension_numbers<[1], [0], [0], [1], [0, 0, 1, 1], [], []>} : vector<16x128xf32>, vector<128x128xf32>, vector<16x128xf32> -> vector<16x128xf32>
    %c0_14 = arith.constant 0 : index
    %c0_15 = arith.constant 0 : index
    %36 = vector.load %arg6[%c0_14, %c0_15] : memref<1x128xf32, #tpu.memory_space<vmem>>, vector<1x128xf32>
    %37 = vector.broadcast %36 : vector<1x128xf32> to vector<16x128xf32>
    %38 = arith.addf %35, %37 : vector<16x128xf32>
    %39 = arith.negf %38 : vector<16x128xf32>
    %40 = math.exp %39 : vector<16x128xf32>
    %cst_16 = arith.constant 1.000000e+00 : f32
    %41 = vector.broadcast %cst_16 : f32 to vector<16x128xf32>
    %42 = arith.addf %41, %40 : vector<16x128xf32>
    %43 = arith.divf %41, %42 : vector<16x128xf32>
    %44 = arith.mulf %38, %43 : vector<16x128xf32>
    %45 = vector.shape_cast %44 : vector<16x128xf32> to vector<8x2x128xf32>
    %c0_17 = arith.constant 0 : index
    %c0_18 = arith.constant 0 : index
    %c0_19 = arith.constant 0 : index
    %46 = vector.load %arg12[%c0_17, %c0_18, %c0_19] : memref<8x2x128xf32, #tpu.memory_space<vmem>>, vector<8x2x128xf32>
    tpu.vector_store %arg12[%c0_17, %c0_18, %c0_19], %45 {strides = array<i32>} : memref<8x2x128xf32, #tpu.memory_space<vmem>>, vector<8x2x128xf32>,
    %c0_20 = arith.constant 0 : index
    %c0_21 = arith.constant 0 : index
    %47 = vector.load %arg7[%c0_20, %c0_21] : memref<128x512xf32, #tpu.memory_space<vmem>>, vector<128x512xf32>
    %cst_22 = arith.constant dense<0.000000e+00> : vector<16x512xf32>
    %48 = tpu.matmul %33, %47, %cst_22 {dimension_numbers = #tpu.dot_dimension_numbers<[1], [0], [0], [1], [0, 0, 1, 1], [], []>} : vector<16x128xf32>, vector<128x512xf32>, vector<16x512xf32> -> vector<16x512xf32>
    %c0_23 = arith.constant 0 : index
    %c0_24 = arith.constant 0 : index
    %49 = vector.load %arg8[%c0_23, %c0_24] : memref<1x512xf32, #tpu.memory_space<vmem>>, vector<1x512xf32>
    %50 = vector.broadcast %49 : vector<1x512xf32> to vector<16x512xf32>
    %51 = arith.addf %48, %50 : vector<16x512xf32>
    %52 = vector.shape_cast %51 : vector<16x512xf32> to vector<8x2x512xf32>
    %c0_25 = arith.constant 0 : index
    %c0_26 = arith.constant 0 : index
    %c0_27 = arith.constant 0 : index
    %53 = vector.load %arg13[%c0_25, %c0_26, %c0_27] : memref<8x2x512xf32, #tpu.memory_space<vmem>>, vector<8x2x512xf32>
    tpu.vector_store %arg13[%c0_25, %c0_26, %c0_27], %52 {strides = array<i32>} : memref<8x2x512xf32, #tpu.memory_space<vmem>>, vector<8x2x512xf32>,
    %c0_28 = arith.constant 0 : index
    %c0_29 = arith.constant 0 : index
    %54 = vector.load %arg9[%c0_28, %c0_29] : memref<128x512xf32, #tpu.memory_space<vmem>>, vector<128x512xf32>
    %c0_30 = arith.constant 0 : index
    %c0_31 = arith.constant 0 : index
    %c0_32 = arith.constant 0 : index
    %55 = vector.load %arg11[%c0_30, %c0_31, %c0_32] : memref<2x2x128xf32, #tpu.memory_space<vmem>>, vector<1x2x128xf32>
    %56 = vector.shape_cast %55 : vector<1x2x128xf32> to vector<2x128xf32>
    %c1 = arith.constant 1 : index
    %c0_33 = arith.constant 0 : index
    %c0_34 = arith.constant 0 : index
    %57 = vector.load %arg11[%c1, %c0_33, %c0_34] : memref<2x2x128xf32, #tpu.memory_space<vmem>>, vector<1x2x128xf32>
    %58 = vector.shape_cast %57 : vector<1x2x128xf32> to vector<2x128xf32>
    %c0_i32_35 = arith.constant 0 : i32
    %59 = arith.index_cast %c0_i32_35 : i32 to index
    %c0_36 = arith.constant 0 : index
    %c0_37 = arith.constant 0 : index
    %60 = vector.load %arg13[%59, %c0_36, %c0_37] : memref<8x2x512xf32, #tpu.memory_space<vmem>>, vector<1x2x512xf32>
    %61 = vector.shape_cast %60 : vector<1x2x512xf32> to vector<2x512xf32>
    %cst_38 = arith.constant dense<0.000000e+00> : vector<2x512xf32>
    %62 = tpu.matmul %56, %54, %cst_38 {dimension_numbers = #tpu.dot_dimension_numbers<[1], [0], [0], [1], [0, 0, 1, 1], [], []>} : vector<2x128xf32>, vector<128x512xf32>, vector<2x512xf32> -> vector<2x512xf32>
    %63 = arith.addf %61, %62 : vector<2x512xf32>
    %64 = vector.extract_strided_slice %63 {offsets = [0, 0], sizes = [2, 384], strides = [1, 1]} : vector<2x512xf32> to vector<2x384xf32>
    %65 = arith.negf %64 : vector<2x384xf32>
    %66 = math.exp %65 : vector<2x384xf32>
    %cst_39 = arith.constant 1.000000e+00 : f32
    %67 = vector.broadcast %cst_39 : f32 to vector<2x384xf32>
    %68 = arith.addf %67, %66 : vector<2x384xf32>
    %69 = arith.divf %67, %68 : vector<2x384xf32>
    %70 = vector.extract_strided_slice %63 {offsets = [0, 384], sizes = [2, 128], strides = [1, 1]} : vector<2x512xf32> to vector<2x128xf32>
    %71 = math.tanh %70 : vector<2x128xf32>
    %72 = vector.extract_strided_slice %69 {offsets = [0, 0], sizes = [2, 128], strides = [1, 1]} : vector<2x384xf32> to vector<2x128xf32>
    %73 = vector.extract_strided_slice %69 {offsets = [0, 128], sizes = [2, 128], strides = [1, 1]} : vector<2x384xf32> to vector<2x128xf32>
    %74 = vector.extract_strided_slice %69 {offsets = [0, 256], sizes = [2, 128], strides = [1, 1]} : vector<2x384xf32> to vector<2x128xf32>
    %75 = arith.mulf %73, %58 : vector<2x128xf32>
    %76 = arith.mulf %72, %71 : vector<2x128xf32>
    %77 = arith.addf %75, %76 : vector<2x128xf32>
    %78 = math.tanh %77 : vector<2x128xf32>
    %79 = arith.mulf %74, %78 : vector<2x128xf32>
    %80 = arith.index_cast %c0_i32_35 : i32 to index
    %c0_40 = arith.constant 0 : index
    %c0_41 = arith.constant 0 : index
    %81 = vector.load %arg14[%80, %c0_40, %c0_41] : memref<8x2x128xf32, #tpu.memory_space<vmem>>, vector<1x2x128xf32>
    %82 = vector.shape_cast %81 : vector<1x2x128xf32> to vector<2x128xf32>
    %83 = vector.shape_cast %79 : vector<2x128xf32> to vector<1x2x128xf32>
    tpu.vector_store %arg14[%80, %c0_40, %c0_41], %83 {strides = array<i32>} : memref<8x2x128xf32, #tpu.memory_space<vmem>>, vector<1x2x128xf32>,
    %c1_i32 = arith.constant 1 : i32
    %84 = arith.index_cast %c1_i32 : i32 to index
    %c0_42 = arith.constant 0 : index
    %c0_43 = arith.constant 0 : index
    %85 = vector.load %arg13[%84, %c0_42, %c0_43] : memref<8x2x512xf32, #tpu.memory_space<vmem>>, vector<1x2x512xf32>
    %86 = vector.shape_cast %85 : vector<1x2x512xf32> to vector<2x512xf32>
    %cst_44 = arith.constant dense<0.000000e+00> : vector<2x512xf32>
    %87 = tpu.matmul %79, %54, %cst_44 {dimension_numbers = #tpu.dot_dimension_numbers<[1], [0], [0], [1], [0, 0, 1, 1], [], []>} : vector<2x128xf32>, vector<128x512xf32>, vector<2x512xf32> -> vector<2x512xf32>
    %88 = arith.addf %86, %87 : vector<2x512xf32>
    %89 = vector.extract_strided_slice %88 {offsets = [0, 0], sizes = [2, 384], strides = [1, 1]} : vector<2x512xf32> to vector<2x384xf32>
    %90 = arith.negf %89 : vector<2x384xf32>
    %91 = math.exp %90 : vector<2x384xf32>
    %cst_45 = arith.constant 1.000000e+00 : f32
    %92 = vector.broadcast %cst_45 : f32 to vector<2x384xf32>
    %93 = arith.addf %92, %91 : vector<2x384xf32>
    %94 = arith.divf %92, %93 : vector<2x384xf32>
    %95 = vector.extract_strided_slice %88 {offsets = [0, 384], sizes = [2, 128], strides = [1, 1]} : vector<2x512xf32> to vector<2x128xf32>
    %96 = math.tanh %95 : vector<2x128xf32>
    %97 = vector.extract_strided_slice %94 {offsets = [0, 0], sizes = [2, 128], strides = [1, 1]} : vector<2x384xf32> to vector<2x128xf32>
    %98 = vector.extract_strided_slice %94 {offsets = [0, 128], sizes = [2, 128], strides = [1, 1]} : vector<2x384xf32> to vector<2x128xf32>
    %99 = vector.extract_strided_slice %94 {offsets = [0, 256], sizes = [2, 128], strides = [1, 1]} : vector<2x384xf32> to vector<2x128xf32>
    %100 = arith.mulf %98, %77 : vector<2x128xf32>
    %101 = arith.mulf %97, %96 : vector<2x128xf32>
    %102 = arith.addf %100, %101 : vector<2x128xf32>
    %103 = math.tanh %102 : vector<2x128xf32>
    %104 = arith.mulf %99, %103 : vector<2x128xf32>
    %105 = arith.index_cast %c1_i32 : i32 to index
    %c0_46 = arith.constant 0 : index
    %c0_47 = arith.constant 0 : index
    %106 = vector.load %arg14[%105, %c0_46, %c0_47] : memref<8x2x128xf32, #tpu.memory_space<vmem>>, vector<1x2x128xf32>
    %107 = vector.shape_cast %106 : vector<1x2x128xf32> to vector<2x128xf32>
    %108 = vector.shape_cast %104 : vector<2x128xf32> to vector<1x2x128xf32>
    tpu.vector_store %arg14[%105, %c0_46, %c0_47], %108 {strides = array<i32>} : memref<8x2x128xf32, #tpu.memory_space<vmem>>, vector<1x2x128xf32>,
    %c2_i32 = arith.constant 2 : i32
    %109 = arith.index_cast %c2_i32 : i32 to index
    %c0_48 = arith.constant 0 : index
    %c0_49 = arith.constant 0 : index
    %110 = vector.load %arg13[%109, %c0_48, %c0_49] : memref<8x2x512xf32, #tpu.memory_space<vmem>>, vector<1x2x512xf32>
    %111 = vector.shape_cast %110 : vector<1x2x512xf32> to vector<2x512xf32>
    %cst_50 = arith.constant dense<0.000000e+00> : vector<2x512xf32>
    %112 = tpu.matmul %104, %54, %cst_50 {dimension_numbers = #tpu.dot_dimension_numbers<[1], [0], [0], [1], [0, 0, 1, 1], [], []>} : vector<2x128xf32>, vector<128x512xf32>, vector<2x512xf32> -> vector<2x512xf32>
    %113 = arith.addf %111, %112 : vector<2x512xf32>
    %114 = vector.extract_strided_slice %113 {offsets = [0, 0], sizes = [2, 384], strides = [1, 1]} : vector<2x512xf32> to vector<2x384xf32>
    %115 = arith.negf %114 : vector<2x384xf32>
    %116 = math.exp %115 : vector<2x384xf32>
    %cst_51 = arith.constant 1.000000e+00 : f32
    %117 = vector.broadcast %cst_51 : f32 to vector<2x384xf32>
    %118 = arith.addf %117, %116 : vector<2x384xf32>
    %119 = arith.divf %117, %118 : vector<2x384xf32>
    %120 = vector.extract_strided_slice %113 {offsets = [0, 384], sizes = [2, 128], strides = [1, 1]} : vector<2x512xf32> to vector<2x128xf32>
    %121 = math.tanh %120 : vector<2x128xf32>
    %122 = vector.extract_strided_slice %119 {offsets = [0, 0], sizes = [2, 128], strides = [1, 1]} : vector<2x384xf32> to vector<2x128xf32>
    %123 = vector.extract_strided_slice %119 {offsets = [0, 128], sizes = [2, 128], strides = [1, 1]} : vector<2x384xf32> to vector<2x128xf32>
    %124 = vector.extract_strided_slice %119 {offsets = [0, 256], sizes = [2, 128], strides = [1, 1]} : vector<2x384xf32> to vector<2x128xf32>
    %125 = arith.mulf %123, %102 : vector<2x128xf32>
    %126 = arith.mulf %122, %121 : vector<2x128xf32>
    %127 = arith.addf %125, %126 : vector<2x128xf32>
    %128 = math.tanh %127 : vector<2x128xf32>
    %129 = arith.mulf %124, %128 : vector<2x128xf32>
    %130 = arith.index_cast %c2_i32 : i32 to index
    %c0_52 = arith.constant 0 : index
    %c0_53 = arith.constant 0 : index
    %131 = vector.load %arg14[%130, %c0_52, %c0_53] : memref<8x2x128xf32, #tpu.memory_space<vmem>>, vector<1x2x128xf32>
    %132 = vector.shape_cast %131 : vector<1x2x128xf32> to vector<2x128xf32>
    %133 = vector.shape_cast %129 : vector<2x128xf32> to vector<1x2x128xf32>
    tpu.vector_store %arg14[%130, %c0_52, %c0_53], %133 {strides = array<i32>} : memref<8x2x128xf32, #tpu.memory_space<vmem>>, vector<1x2x128xf32>,
    %c3_i32 = arith.constant 3 : i32
    %134 = arith.index_cast %c3_i32 : i32 to index
    %c0_54 = arith.constant 0 : index
    %c0_55 = arith.constant 0 : index
    %135 = vector.load %arg13[%134, %c0_54, %c0_55] : memref<8x2x512xf32, #tpu.memory_space<vmem>>, vector<1x2x512xf32>
    %136 = vector.shape_cast %135 : vector<1x2x512xf32> to vector<2x512xf32>
    %cst_56 = arith.constant dense<0.000000e+00> : vector<2x512xf32>
    %137 = tpu.matmul %129, %54, %cst_56 {dimension_numbers = #tpu.dot_dimension_numbers<[1], [0], [0], [1], [0, 0, 1, 1], [], []>} : vector<2x128xf32>, vector<128x512xf32>, vector<2x512xf32> -> vector<2x512xf32>
    %138 = arith.addf %136, %137 : vector<2x512xf32>
    %139 = vector.extract_strided_slice %138 {offsets = [0, 0], sizes = [2, 384], strides = [1, 1]} : vector<2x512xf32> to vector<2x384xf32>
    %140 = arith.negf %139 : vector<2x384xf32>
    %141 = math.exp %140 : vector<2x384xf32>
    %cst_57 = arith.constant 1.000000e+00 : f32
    %142 = vector.broadcast %cst_57 : f32 to vector<2x384xf32>
    %143 = arith.addf %142, %141 : vector<2x384xf32>
    %144 = arith.divf %142, %143 : vector<2x384xf32>
    %145 = vector.extract_strided_slice %138 {offsets = [0, 384], sizes = [2, 128], strides = [1, 1]} : vector<2x512xf32> to vector<2x128xf32>
    %146 = math.tanh %145 : vector<2x128xf32>
    %147 = vector.extract_strided_slice %144 {offsets = [0, 0], sizes = [2, 128], strides = [1, 1]} : vector<2x384xf32> to vector<2x128xf32>
    %148 = vector.extract_strided_slice %144 {offsets = [0, 128], sizes = [2, 128], strides = [1, 1]} : vector<2x384xf32> to vector<2x128xf32>
    %149 = vector.extract_strided_slice %144 {offsets = [0, 256], sizes = [2, 128], strides = [1, 1]} : vector<2x384xf32> to vector<2x128xf32>
    %150 = arith.mulf %148, %127 : vector<2x128xf32>
    %151 = arith.mulf %147, %146 : vector<2x128xf32>
    %152 = arith.addf %150, %151 : vector<2x128xf32>
    %153 = math.tanh %152 : vector<2x128xf32>
    %154 = arith.mulf %149, %153 : vector<2x128xf32>
    %155 = arith.index_cast %c3_i32 : i32 to index
    %c0_58 = arith.constant 0 : index
    %c0_59 = arith.constant 0 : index
    %156 = vector.load %arg14[%155, %c0_58, %c0_59] : memref<8x2x128xf32, #tpu.memory_space<vmem>>, vector<1x2x128xf32>
    %157 = vector.shape_cast %156 : vector<1x2x128xf32> to vector<2x128xf32>
    %158 = vector.shape_cast %154 : vector<2x128xf32> to vector<1x2x128xf32>
    tpu.vector_store %arg14[%155, %c0_58, %c0_59], %158 {strides = array<i32>} : memref<8x2x128xf32, #tpu.memory_space<vmem>>, vector<1x2x128xf32>,
    %c4_i32 = arith.constant 4 : i32
    %159 = arith.index_cast %c4_i32 : i32 to index
    %c0_60 = arith.constant 0 : index
    %c0_61 = arith.constant 0 : index
    %160 = vector.load %arg13[%159, %c0_60, %c0_61] : memref<8x2x512xf32, #tpu.memory_space<vmem>>, vector<1x2x512xf32>
    %161 = vector.shape_cast %160 : vector<1x2x512xf32> to vector<2x512xf32>
    %cst_62 = arith.constant dense<0.000000e+00> : vector<2x512xf32>
    %162 = tpu.matmul %154, %54, %cst_62 {dimension_numbers = #tpu.dot_dimension_numbers<[1], [0], [0], [1], [0, 0, 1, 1], [], []>} : vector<2x128xf32>, vector<128x512xf32>, vector<2x512xf32> -> vector<2x512xf32>
    %163 = arith.addf %161, %162 : vector<2x512xf32>
    %164 = vector.extract_strided_slice %163 {offsets = [0, 0], sizes = [2, 384], strides = [1, 1]} : vector<2x512xf32> to vector<2x384xf32>
    %165 = arith.negf %164 : vector<2x384xf32>
    %166 = math.exp %165 : vector<2x384xf32>
    %cst_63 = arith.constant 1.000000e+00 : f32
    %167 = vector.broadcast %cst_63 : f32 to vector<2x384xf32>
    %168 = arith.addf %167, %166 : vector<2x384xf32>
    %169 = arith.divf %167, %168 : vector<2x384xf32>
    %170 = vector.extract_strided_slice %163 {offsets = [0, 384], sizes = [2, 128], strides = [1, 1]} : vector<2x512xf32> to vector<2x128xf32>
    %171 = math.tanh %170 : vector<2x128xf32>
    %172 = vector.extract_strided_slice %169 {offsets = [0, 0], sizes = [2, 128], strides = [1, 1]} : vector<2x384xf32> to vector<2x128xf32>
    %173 = vector.extract_strided_slice %169 {offsets = [0, 128], sizes = [2, 128], strides = [1, 1]} : vector<2x384xf32> to vector<2x128xf32>
    %174 = vector.extract_strided_slice %169 {offsets = [0, 256], sizes = [2, 128], strides = [1, 1]} : vector<2x384xf32> to vector<2x128xf32>
    %175 = arith.mulf %173, %152 : vector<2x128xf32>
    %176 = arith.mulf %172, %171 : vector<2x128xf32>
    %177 = arith.addf %175, %176 : vector<2x128xf32>
    %178 = math.tanh %177 : vector<2x128xf32>
    %179 = arith.mulf %174, %178 : vector<2x128xf32>
    %180 = arith.index_cast %c4_i32 : i32 to index
    %c0_64 = arith.constant 0 : index
    %c0_65 = arith.constant 0 : index
    %181 = vector.load %arg14[%180, %c0_64, %c0_65] : memref<8x2x128xf32, #tpu.memory_space<vmem>>, vector<1x2x128xf32>
    %182 = vector.shape_cast %181 : vector<1x2x128xf32> to vector<2x128xf32>
    %183 = vector.shape_cast %179 : vector<2x128xf32> to vector<1x2x128xf32>
    tpu.vector_store %arg14[%180, %c0_64, %c0_65], %183 {strides = array<i32>} : memref<8x2x128xf32, #tpu.memory_space<vmem>>, vector<1x2x128xf32>,
    %c5_i32 = arith.constant 5 : i32
    %184 = arith.index_cast %c5_i32 : i32 to index
    %c0_66 = arith.constant 0 : index
    %c0_67 = arith.constant 0 : index
    %185 = vector.load %arg13[%184, %c0_66, %c0_67] : memref<8x2x512xf32, #tpu.memory_space<vmem>>, vector<1x2x512xf32>
    %186 = vector.shape_cast %185 : vector<1x2x512xf32> to vector<2x512xf32>
    %cst_68 = arith.constant dense<0.000000e+00> : vector<2x512xf32>
    %187 = tpu.matmul %179, %54, %cst_68 {dimension_numbers = #tpu.dot_dimension_numbers<[1], [0], [0], [1], [0, 0, 1, 1], [], []>} : vector<2x128xf32>, vector<128x512xf32>, vector<2x512xf32> -> vector<2x512xf32>
    %188 = arith.addf %186, %187 : vector<2x512xf32>
    %189 = vector.extract_strided_slice %188 {offsets = [0, 0], sizes = [2, 384], strides = [1, 1]} : vector<2x512xf32> to vector<2x384xf32>
    %190 = arith.negf %189 : vector<2x384xf32>
    %191 = math.exp %190 : vector<2x384xf32>
    %cst_69 = arith.constant 1.000000e+00 : f32
    %192 = vector.broadcast %cst_69 : f32 to vector<2x384xf32>
    %193 = arith.addf %192, %191 : vector<2x384xf32>
    %194 = arith.divf %192, %193 : vector<2x384xf32>
    %195 = vector.extract_strided_slice %188 {offsets = [0, 384], sizes = [2, 128], strides = [1, 1]} : vector<2x512xf32> to vector<2x128xf32>
    %196 = math.tanh %195 : vector<2x128xf32>
    %197 = vector.extract_strided_slice %194 {offsets = [0, 0], sizes = [2, 128], strides = [1, 1]} : vector<2x384xf32> to vector<2x128xf32>
    %198 = vector.extract_strided_slice %194 {offsets = [0, 128], sizes = [2, 128], strides = [1, 1]} : vector<2x384xf32> to vector<2x128xf32>
    %199 = vector.extract_strided_slice %194 {offsets = [0, 256], sizes = [2, 128], strides = [1, 1]} : vector<2x384xf32> to vector<2x128xf32>
    %200 = arith.mulf %198, %177 : vector<2x128xf32>
    %201 = arith.mulf %197, %196 : vector<2x128xf32>
    %202 = arith.addf %200, %201 : vector<2x128xf32>
    %203 = math.tanh %202 : vector<2x128xf32>
    %204 = arith.mulf %199, %203 : vector<2x128xf32>
    %205 = arith.index_cast %c5_i32 : i32 to index
    %c0_70 = arith.constant 0 : index
    %c0_71 = arith.constant 0 : index
    %206 = vector.load %arg14[%205, %c0_70, %c0_71] : memref<8x2x128xf32, #tpu.memory_space<vmem>>, vector<1x2x128xf32>
    %207 = vector.shape_cast %206 : vector<1x2x128xf32> to vector<2x128xf32>
    %208 = vector.shape_cast %204 : vector<2x128xf32> to vector<1x2x128xf32>
    tpu.vector_store %arg14[%205, %c0_70, %c0_71], %208 {strides = array<i32>} : memref<8x2x128xf32, #tpu.memory_space<vmem>>, vector<1x2x128xf32>,
    %c6_i32 = arith.constant 6 : i32
    %209 = arith.index_cast %c6_i32 : i32 to index
    %c0_72 = arith.constant 0 : index
    %c0_73 = arith.constant 0 : index
    %210 = vector.load %arg13[%209, %c0_72, %c0_73] : memref<8x2x512xf32, #tpu.memory_space<vmem>>, vector<1x2x512xf32>
    %211 = vector.shape_cast %210 : vector<1x2x512xf32> to vector<2x512xf32>
    %cst_74 = arith.constant dense<0.000000e+00> : vector<2x512xf32>
    %212 = tpu.matmul %204, %54, %cst_74 {dimension_numbers = #tpu.dot_dimension_numbers<[1], [0], [0], [1], [0, 0, 1, 1], [], []>} : vector<2x128xf32>, vector<128x512xf32>, vector<2x512xf32> -> vector<2x512xf32>
    %213 = arith.addf %211, %212 : vector<2x512xf32>
    %214 = vector.extract_strided_slice %213 {offsets = [0, 0], sizes = [2, 384], strides = [1, 1]} : vector<2x512xf32> to vector<2x384xf32>
    %215 = arith.negf %214 : vector<2x384xf32>
    %216 = math.exp %215 : vector<2x384xf32>
    %cst_75 = arith.constant 1.000000e+00 : f32
    %217 = vector.broadcast %cst_75 : f32 to vector<2x384xf32>
    %218 = arith.addf %217, %216 : vector<2x384xf32>
    %219 = arith.divf %217, %218 : vector<2x384xf32>
    %220 = vector.extract_strided_slice %213 {offsets = [0, 384], sizes = [2, 128], strides = [1, 1]} : vector<2x512xf32> to vector<2x128xf32>
    %221 = math.tanh %220 : vector<2x128xf32>
    %222 = vector.extract_strided_slice %219 {offsets = [0, 0], sizes = [2, 128], strides = [1, 1]} : vector<2x384xf32> to vector<2x128xf32>
    %223 = vector.extract_strided_slice %219 {offsets = [0, 128], sizes = [2, 128], strides = [1, 1]} : vector<2x384xf32> to vector<2x128xf32>
    %224 = vector.extract_strided_slice %219 {offsets = [0, 256], sizes = [2, 128], strides = [1, 1]} : vector<2x384xf32> to vector<2x128xf32>
    %225 = arith.mulf %223, %202 : vector<2x128xf32>
    %226 = arith.mulf %222, %221 : vector<2x128xf32>
    %227 = arith.addf %225, %226 : vector<2x128xf32>
    %228 = math.tanh %227 : vector<2x128xf32>
    %229 = arith.mulf %224, %228 : vector<2x128xf32>
    %230 = arith.index_cast %c6_i32 : i32 to index
    %c0_76 = arith.constant 0 : index
    %c0_77 = arith.constant 0 : index
    %231 = vector.load %arg14[%230, %c0_76, %c0_77] : memref<8x2x128xf32, #tpu.memory_space<vmem>>, vector<1x2x128xf32>
    %232 = vector.shape_cast %231 : vector<1x2x128xf32> to vector<2x128xf32>
    %233 = vector.shape_cast %229 : vector<2x128xf32> to vector<1x2x128xf32>
    tpu.vector_store %arg14[%230, %c0_76, %c0_77], %233 {strides = array<i32>} : memref<8x2x128xf32, #tpu.memory_space<vmem>>, vector<1x2x128xf32>,
    %c7_i32 = arith.constant 7 : i32
    %234 = arith.index_cast %c7_i32 : i32 to index
    %c0_78 = arith.constant 0 : index
    %c0_79 = arith.constant 0 : index
    %235 = vector.load %arg13[%234, %c0_78, %c0_79] : memref<8x2x512xf32, #tpu.memory_space<vmem>>, vector<1x2x512xf32>
    %236 = vector.shape_cast %235 : vector<1x2x512xf32> to vector<2x512xf32>
    %cst_80 = arith.constant dense<0.000000e+00> : vector<2x512xf32>
    %237 = tpu.matmul %229, %54, %cst_80 {dimension_numbers = #tpu.dot_dimension_numbers<[1], [0], [0], [1], [0, 0, 1, 1], [], []>} : vector<2x128xf32>, vector<128x512xf32>, vector<2x512xf32> -> vector<2x512xf32>
    %238 = arith.addf %236, %237 : vector<2x512xf32>
    %239 = vector.extract_strided_slice %238 {offsets = [0, 0], sizes = [2, 384], strides = [1, 1]} : vector<2x512xf32> to vector<2x384xf32>
    %240 = arith.negf %239 : vector<2x384xf32>
    %241 = math.exp %240 : vector<2x384xf32>
    %cst_81 = arith.constant 1.000000e+00 : f32
    %242 = vector.broadcast %cst_81 : f32 to vector<2x384xf32>
    %243 = arith.addf %242, %241 : vector<2x384xf32>
    %244 = arith.divf %242, %243 : vector<2x384xf32>
    %245 = vector.extract_strided_slice %238 {offsets = [0, 384], sizes = [2, 128], strides = [1, 1]} : vector<2x512xf32> to vector<2x128xf32>
    %246 = math.tanh %245 : vector<2x128xf32>
    %247 = vector.extract_strided_slice %244 {offsets = [0, 0], sizes = [2, 128], strides = [1, 1]} : vector<2x384xf32> to vector<2x128xf32>
    %248 = vector.extract_strided_slice %244 {offsets = [0, 128], sizes = [2, 128], strides = [1, 1]} : vector<2x384xf32> to vector<2x128xf32>
    %249 = vector.extract_strided_slice %244 {offsets = [0, 256], sizes = [2, 128], strides = [1, 1]} : vector<2x384xf32> to vector<2x128xf32>
    %250 = arith.mulf %248, %227 : vector<2x128xf32>
    %251 = arith.mulf %247, %246 : vector<2x128xf32>
    %252 = arith.addf %250, %251 : vector<2x128xf32>
    %253 = math.tanh %252 : vector<2x128xf32>
    %254 = arith.mulf %249, %253 : vector<2x128xf32>
    %255 = arith.index_cast %c7_i32 : i32 to index
    %c0_82 = arith.constant 0 : index
    %c0_83 = arith.constant 0 : index
    %256 = vector.load %arg14[%255, %c0_82, %c0_83] : memref<8x2x128xf32, #tpu.memory_space<vmem>>, vector<1x2x128xf32>
    %257 = vector.shape_cast %256 : vector<1x2x128xf32> to vector<2x128xf32>
    %258 = vector.shape_cast %254 : vector<2x128xf32> to vector<1x2x128xf32>
    tpu.vector_store %arg14[%255, %c0_82, %c0_83], %258 {strides = array<i32>} : memref<8x2x128xf32, #tpu.memory_space<vmem>>, vector<1x2x128xf32>,
    %c8_i32 = arith.constant 8 : i32
    %c0_84 = arith.constant 0 : index
    %c0_85 = arith.constant 0 : index
    %c0_86 = arith.constant 0 : index
    %259 = vector.load %arg11[%c0_84, %c0_85, %c0_86] : memref<2x2x128xf32, #tpu.memory_space<vmem>>, vector<1x2x128xf32>
    %260 = vector.shape_cast %259 : vector<1x2x128xf32> to vector<2x128xf32>
    %261 = vector.shape_cast %254 : vector<2x128xf32> to vector<1x2x128xf32>
    tpu.vector_store %arg11[%c0_84, %c0_85, %c0_86], %261 {strides = array<i32>} : memref<2x2x128xf32, #tpu.memory_space<vmem>>, vector<1x2x128xf32>,
    %c1_87 = arith.constant 1 : index
    %c0_88 = arith.constant 0 : index
    %c0_89 = arith.constant 0 : index
    %262 = vector.load %arg11[%c1_87, %c0_88, %c0_89] : memref<2x2x128xf32, #tpu.memory_space<vmem>>, vector<1x2x128xf32>
    %263 = vector.shape_cast %262 : vector<1x2x128xf32> to vector<2x128xf32>
    %264 = vector.shape_cast %252 : vector<2x128xf32> to vector<1x2x128xf32>
    tpu.vector_store %arg11[%c1_87, %c0_88, %c0_89], %264 {strides = array<i32>} : memref<2x2x128xf32, #tpu.memory_space<vmem>>, vector<1x2x128xf32>,
    %c0_90 = arith.constant 0 : index
    %c0_91 = arith.constant 0 : index
    %c0_92 = arith.constant 0 : index
    %265 = vector.load %arg14[%c0_90, %c0_91, %c0_92] : memref<8x2x128xf32, #tpu.memory_space<vmem>>, vector<8x2x128xf32>
    %c0_93 = arith.constant 0 : index
    %c0_94 = arith.constant 0 : index
    %c0_95 = arith.constant 0 : index
    %266 = vector.load %arg12[%c0_93, %c0_94, %c0_95] : memref<8x2x128xf32, #tpu.memory_space<vmem>>, vector<8x2x128xf32>
    %267 = arith.mulf %265, %266 : vector<8x2x128xf32>
    %c0_96 = arith.constant 0 : index
    %c0_97 = arith.constant 0 : index
    %c0_98 = arith.constant 0 : index
    %268 = vector.load %arg2[%c0_96, %c0_97, %c0_98] : memref<8x2x128xf32, #tpu.memory_space<vmem>>, vector<8x2x128xf32>
    %269 = arith.addf %267, %268 : vector<8x2x128xf32>
    %c0_99 = arith.constant 0 : index
    %c0_100 = arith.constant 0 : index
    %c0_101 = arith.constant 0 : index
    %270 = vector.load %arg10[%c0_99, %c0_100, %c0_101] : memref<8x2x128xf32, #tpu.memory_space<vmem>>, vector<8x2x128xf32>
    tpu.vector_store %arg10[%c0_99, %c0_100, %c0_101], %269 {strides = array<i32>} : memref<8x2x128xf32, #tpu.memory_space<vmem>>, vector<8x2x128xf32>,
    return
  }
  func.func @transform_0(%arg0: i32, %arg1: i32) -> (i32, i32, i32) {
    %c0_i32 = arith.constant 0 : i32
    %c0_i32_0 = arith.constant 0 : i32
    return %arg1, %arg0, %c0_i32 : i32, i32, i32
  }
  func.func @transform_1(%arg0: i32, %arg1: i32) -> (i32, i32) {
    %c0_i32 = arith.constant 0 : i32
    %c0_i32_0 = arith.constant 0 : i32
    %c0_i32_1 = arith.constant 0 : i32
    return %c0_i32, %c0_i32_0 : i32, i32
  }
  func.func @transform_2(%arg0: i32, %arg1: i32) -> (i32, i32) {
    %c0_i32 = arith.constant 0 : i32
    %c0_i32_0 = arith.constant 0 : i32
    %c0_i32_1 = arith.constant 0 : i32
    return %c0_i32, %c0_i32_0 : i32, i32
  }
  func.func @transform_3(%arg0: i32, %arg1: i32) -> (i32, i32) {
    %c0_i32 = arith.constant 0 : i32
    %c0_i32_0 = arith.constant 0 : i32
    %c0_i32_1 = arith.constant 0 : i32
    return %c0_i32, %c0_i32_0 : i32, i32
  }
  func.func @transform_4(%arg0: i32, %arg1: i32) -> (i32, i32) {
    %c0_i32 = arith.constant 0 : i32
    %c0_i32_0 = arith.constant 0 : i32
    %c0_i32_1 = arith.constant 0 : i32
    return %c0_i32, %c0_i32_0 : i32, i32
  }
  func.func @transform_5(%arg0: i32, %arg1: i32) -> (i32, i32) {
    %c0_i32 = arith.constant 0 : i32
    %c0_i32_0 = arith.constant 0 : i32
    %c0_i32_1 = arith.constant 0 : i32
    return %c0_i32, %c0_i32_0 : i32, i32
  }
  func.func @transform_6(%arg0: i32, %arg1: i32) -> (i32, i32) {
    %c0_i32 = arith.constant 0 : i32
    %c0_i32_0 = arith.constant 0 : i32
    %c0_i32_1 = arith.constant 0 : i32
    return %c0_i32, %c0_i32_0 : i32, i32
  }
  func.func @transform_7(%arg0: i32, %arg1: i32) -> (i32, i32) {
    %c0_i32 = arith.constant 0 : i32
    %c0_i32_0 = arith.constant 0 : i32
    %c0_i32_1 = arith.constant 0 : i32
    return %c0_i32, %c0_i32_0 : i32, i32
  }
  func.func @transform_8(%arg0: i32, %arg1: i32) -> (i32, i32, i32) {
    %c0_i32 = arith.constant 0 : i32
    %c0_i32_0 = arith.constant 0 : i32
    return %arg1, %arg0, %c0_i32 : i32, i32, i32
  }
}

</mosaic_0001>

<bundles_post_ra>
// kernel: tpu_custom_call.1
= control target key start
LH: loop header
LB: loop body
LE: loop exit
PB: predicated region body
PF: predicated region fallthrough
CT: control target
= control target key end

     0   :  { %13 = vsyncpa [#allocation7], 0  ;;  %s4102_s0 = inlined_call_operand.hbm [shape: f32[8,2,128], index: 0, kind: input, shape index: {}]   ;;  %s4103_s1 = inlined_call_operand.vmem [shape: f32[1,128], index: 1, kind: input, shape index: {}]   ;;  %s4104_s2 = inlined_call_operand.vmem [shape: f32[1,128], index: 2, kind: input, shape index: {}]   ;;  %s4105_s3 = inlined_call_operand.hbm [shape: f32[128,128], index: 3, kind: input, shape index: {}]   ;;  %s4106_s4 = inlined_call_operand.vmem [shape: f32[1,128], index: 4, kind: input, shape index: {}]   ;;  %s4107_s5 = inlined_call_operand.hbm [shape: f32[128,512], index: 5, kind: input, shape index: {}]   ;;  %s4108_s6 = inlined_call_operand.vmem [shape: f32[1,512], index: 6, kind: input, shape index: {}]   ;;  %s4109_s7 = inlined_call_operand.hbm [shape: f32[128,512], index: 7, kind: input, shape index: {}]   ;;  %s4110_s8 = inlined_call_operand.hbm [shape: f32[8,2,128], index: 8, kind: output, shape index: {}]  }
   0x1   :  { %14 = vsyncpa [#allocation10], 0 }
   0x2   :  { %15 = vsyncpa [#allocation13], 0 }
   0x3   :  { %16 = vsyncpa [#allocation8], 0  ;;  %s2989_s27 = smov [#allocation9]  }
   0x4   :  { %s38_s28 = sshll.u32 %s2989_s27, 4  ;;  %s39_s28 = int_to_ptr.vmem [resolvable:$true] %s38_s28 }
   0x5   :  { %s2889_s29 = scalar_lea.vmem %s39_s28, 2048  ;;  %p2894_p1 = scmp.lt.s32.totalorder %s39_s28, %s39_s28 }
   0x6   :  { %p2890_p0 = scmp.ne.s32.totalorder %s39_s28, %s2889_s29  ;;  %p2895_p2 = scmp.lt.s32.totalorder %s2889_s29, %s2889_s29 }
   0x8   :  { %p2896_p3 = por %p2895_p2, %p2894_p1 }
   0xa   :  { %p2897_p4 = pnand %p2896_p3, %p2890_p0 }
   0xc   :  { %2900 = shalt.err (!%p2897_p4)
}
   0xd   :  { %s2990_s30 = smov 128   ;;  %s2991_s9 = smov 8  }
   0xe   :  { %44 = dma.hbm_to_vmem [thread:$0]  %s4105_s3, 2048, %s39_s28, [#allocation10], %s2990_s30, %s2990_s30, %s2991_s9  }
   0xf   :  { %s2992_s12 = smov [#allocation6]  }
  0x10   :  { %s22_s13 = sshll.u32 %s2992_s12, 4  ;;  %s23_s13 = int_to_ptr.vmem [resolvable:$true] %s22_s13 }
  0x11   :  { %s2909_s14 = scalar_lea.vmem %s23_s13, 256  ;;  %p2914_p6 = scmp.lt.s32.totalorder %s23_s13, %s23_s13 }
  0x12   :  { %p2910_p5 = scmp.ne.s32.totalorder %s23_s13, %s2909_s14  ;;  %p2915_p7 = scmp.lt.s32.totalorder %s2909_s14, %s2909_s14 }
  0x14   :  { %p2916_p8 = por %p2915_p7, %p2914_p6 }
  0x16   :  { %p2917_p9 = pnand %p2916_p8, %p2910_p5 }
  0x18   :  { %2920 = shalt.err (!%p2917_p9)
}
  0x19   :  { %s2993_s15 = smov 32   ;;  %s2994_s16 = smov 2  }
  0x1a   :  { %28 = dma.hbm_to_vmem [thread:$0]  %s4102_s0, 256, %s23_s13, [#allocation7], %s2993_s15, %s2993_s15, %s2994_s16  }
  0x1b   :  { %s2995_s3 = smov [#allocation11]   ;;  %s2996_s20 = smov [#allocation12]  }
  0x1c   :  { %s52_s19 = sshll.u32 %s2995_s3, 4  ;;  %s66_s21 = sshll.u32 %s2996_s20, 4  ;;  %s53_s19 = int_to_ptr.vmem [resolvable:$true] %s52_s19  ;;  %s67_s21 = int_to_ptr.vmem [resolvable:$true] %s66_s21 }
  0x1d   :  { %s2929_s22 = scalar_lea.vmem %s53_s19, 8192  ;;  %p2934_p11 = scmp.lt.s32.totalorder %s53_s19, %s53_s19 }
  0x1e   :  { %p2930_p10 = scmp.ne.s32.totalorder %s53_s19, %s2929_s22  ;;  %p2935_p12 = scmp.lt.s32.totalorder %s2929_s22, %s2929_s22 }
  0x20   :  { %p2936_p13 = por %p2935_p12, %p2934_p11 }
  0x22   :  { %p2937_p0 = pnand %p2936_p13, %p2930_p10 }
  0x24   :  { %2940 = shalt.err (!%p2937_p0)
}
  0x25   :  { %s2997_s23 = smov 512   ;;  %s2949_s0 = scalar_lea.vmem %s67_s21, 8192 }
  0x26   :  { %58 = dma.hbm_to_vmem [thread:$0]  %s4107_s5, 8192, %s53_s19, [#allocation10], %s2997_s23, %s2997_s23, %s2993_s15  }
  0x27   :  { %p2950_p1 = scmp.ne.s32.totalorder %s67_s21, %s2949_s0  ;;  %p2954_p2 = scmp.lt.s32.totalorder %s67_s21, %s67_s21 }
  0x28   :  { %p2955_p3 = scmp.lt.s32.totalorder %s2949_s0, %s2949_s0 }
  0x2a   :  { %p2956_p4 = por %p2955_p3, %p2954_p2 }
  0x2c   :  { %p2957_p5 = pnand %p2956_p4, %p2950_p1 }
  0x2e   :  { %2960 = shalt.err (!%p2957_p5)
}
  0x2f   :  { %72 = dma.hbm_to_vmem [thread:$0]  %s4109_s7, 8192, %s67_s21, [#allocation13], %s2997_s23, %s2997_s23, %s2993_s15  }
  0x30   :  { %2981 = dma.done.wait [#allocation7], 256  }
  0x31   :  { %2982 = vsyncadd [#allocation7], 4294967040 }
  0x32   :  { %2983 = dma.done.wait [#allocation10], 10240  }
  0x33   :  { %2984 = vsyncadd [#allocation10], 4294957056 }
  0x34   :  { %2985 = dma.done.wait [#allocation13], 8192  }
  0x35   :  { %2986 = vsyncadd [#allocation13], 4294959104  ;;  %v99_v0 = vlaneseq  ;;  %v2998_v1 = vmov 1983009808   ;;  %v91_v6 = vld [vmem:[#allocation6] sm:$0x3] }
  0x36   :  { %v115_v2 = vunpack.c.l.s4 %v2998_v1  ;;  %v92_v7 = vld [vmem:[#allocation6 + $0x2] sm:$0x3]  ;;  %v93_v8 = vld [vmem:[#allocation6 + $0x4] sm:$0x3]  ;;  %v94_v9 = vld [vmem:[#allocation6 + $0x6] sm:$0x3] }
  0x37   :  { %v3067_v3 = vshrl.u32 %v99_v0, 7  ;;  %v112_v10 = vcombine.low %v91_v6, %v92_v7  ;;  %v3072_v11 = vld [vmem:[#allocation6 + $0x8] sm:$0x3]  ;;  %v3074_v12 = vld [vmem:[#allocation6 + $0xa] sm:$0x3]  ;;  %v113_v13 = vcombine.low %v93_v8, %v94_v9  ;;  %v4111_v24 = vmov 0.0  }
  0x38   :  { %v116_v4 = vunpack.c.0.s8 %v115_v2  ;;  %v97_v14 = vld [vmem:[#allocation6 + $0xc] sm:$0x3]  ;;  %v98_v15 = vld [vmem:[#allocation6 + $0xe] sm:$0x3]  ;;  %v129_v16 = vcombine.low %v3072_v11, %v3074_v12  ;;  %89 = vst [vmem:[#allocation2] sm:$0x3] %v4111_v24  ;;  %822 = vmatprep.mubr.f32.mxu1 %v4111_v24 }
  0x39   :  { %v130_v18 = vcombine.low %v97_v14, %v98_v15  ;;  %90 = vst [vmem:[#allocation2 + $0x2] sm:$0x3] %v4111_v24  ;;  %v100_v25 = vand.u32 127, %v99_v0  ;;  %v3000_v26 = vmov 269488144  }
  0x3a   :  { %v3070_v5 = vsub.s32 %v116_v4, %v3067_v3  ;;  %v157_v27 = vunpack.c.l.s4 %v3000_v26  ;;  %v3001_v28 = vmov 842150450   ;;  %v3002_v30 = vmov 1414812756  }
  0x3b   :  { %vm101_vm0 = vcmp.lt.s32.totalorder %v100_v25, 32  ;;  %v164_v29 = vunpack.c.l.s4 %v3001_v28  ;;  %v171_v31 = vunpack.c.l.s4 %v3002_v30  ;;  %v3003_v32 = vmov 1987475062  }
  0x3c   :  { %v120_v17 = vrot.slane %v112_v10, %v3070_v5  ;;  %v127_v19 = vrot.slane %v113_v13, %v3070_v5  ;;  %v137_v20 = vrot.slane %v129_v16, %v3070_v5  ;;  %v144_v21 = vrot.slane %v130_v18, %v3070_v5 }
  0x3d   :  { %v178_v33 = vunpack.c.l.s4 %v3003_v32  ;;  %v2654_v34 = vsel %vm101_vm0, 1.0, %v4111_v24  ;;  %v158_v35 = vunpack.c.0.s8 %v157_v27  ;;  %v165_v36 = vunpack.c.0.s8 %v164_v29 }
  0x3e   :  { %v128_v22 = vcombine.low %v120_v17, %v127_v19  ;;  %v145_v23 = vcombine.low %v137_v20, %v144_v21  ;;  %v172_v37 = vunpack.c.0.s8 %v171_v31  ;;  %v229_v39 = vcombine.high %v2654_v34, %v2654_v34 }
  0x3f   :  { %v179_v38 = vunpack.c.0.s8 %v178_v33  ;;  %v3087_v40 = vsub.s32 %v158_v35, %v3067_v3  ;;  %v3090_v41 = vsub.s32 %v165_v36, %v3067_v3  ;;  %v236_v45 = vrot.slane %v2654_v34, %v3070_v5  ;;  %v733_v33 = vld [vmem:[#allocation11 + $0x1e8] sm:$0xff]  ;;  %v732_v34 = vld [vmem:[#allocation11 + $0x1e0] sm:$0xff]  ;;  %v479_v36 = vld [vmem:[#allocation9 + $0x78] sm:$0xff] }
  0x40   :  { %148 = vadd.xlane.f32.xlu0 %v128_v22  ;;  %v3093_v42 = vsub.s32 %v172_v37, %v3067_v3  ;;  %v243_v46 = vrot.slane %v229_v39, %v3070_v5  ;;  %758 = vmatprep.subr.mxu1 %v733_v33  ;;  %v729_v35 = vld [vmem:[#allocation11 + $0x1c8] sm:$0xff]  ;;  %v728_v37 = vld [vmem:[#allocation11 + $0x1c0] sm:$0xff]  ;;  %v478_v39 = vld [vmem:[#allocation9 + $0x70] sm:$0xff] }
  0x41   :  { %v3096_v43 = vsub.s32 %v179_v38, %v3067_v3  ;;  %v244_v53 = vcombine.high %v236_v45, %v236_v45  ;;  %759 = vmatpush1.msra.mxu1 %v732_v34  ;;  %2690 = vmatprep.subr.mxu0 %v479_v36  ;;  %v725_v38 = vld [vmem:[#allocation11 + $0x1a8] sm:$0xff] }
  0x42   :  { %v245_v54 = vcombine.high %v243_v46, %v243_v46  ;;  %760 = vmatprep.subr.mxu1 %v729_v35  ;;  %2691 = vmatpush3.msra.mxu0 %v479_v36  ;;  %v3146_v33 = vld [vmem:[#allocation12 + $0x1e8] sm:$0xff] }
  0x43   :  { %761 = vmatpush1.msra.mxu1 %v728_v37  ;;  %2692 = vmatprep.subr.mxu0 %v478_v39 }
  0x44   :  { %150 = vadd.xlane.f32.xlu0 %v145_v23  ;;  %762 = vmatprep.subr.mxu1 %v725_v38 }
  0x45   :  { %2693 = vmatpush3.msra.mxu0 %v478_v39 }
  0xc9   :  { %v149_v44 = vpop.xlane.xlu0 %148 }
  0xca   :  { %v152_v47 = vmul.f32 0.03125, %v149_v44  ;;  %v724_v44 = vld [vmem:[#allocation11 + $0x1a0] sm:$0xff] }
  0xcb   :  { %763 = vmatpush1.msra.mxu1 %v724_v44  ;;  %v2655_v44 = vld [vmem:[%s4103_s1] ss:$0 sm:$0xff] }
  0xcc   :  { %v162_v48 = vrot.slane %v152_v47, %v3087_v40  ;;  %v169_v49 = vrot.slane %v152_v47, %v3090_v41  ;;  %v176_v50 = vrot.slane %v152_v47, %v3093_v42  ;;  %v183_v51 = vrot.slane %v152_v47, %v3096_v43  ;;  %v720_v47 = vld [vmem:[#allocation11 + $0x180] sm:$0xff] }
  0xcd   :  { %v151_v52 = vpop.xlane.xlu0 %150 }
  0xce   :  { %v153_v55 = vmul.f32 0.03125, %v151_v52  ;;  %v220_v56 = vsub.f32 %v91_v6, %v162_v48  ;;  %v221_v57 = vsub.f32 %v92_v7, %v169_v49  ;;  %v222_v58 = vsub.f32 %v93_v8, %v176_v50  ;;  %v717_v48 = vld [vmem:[#allocation11 + $0x168] sm:$0xff]  ;;  %v476_v49 = vld [vmem:[#allocation9 + $0x60] sm:$0xff]  ;;  %v475_v52 = vld [vmem:[#allocation9 + $0x58] sm:$0xff] }
  0xcf   :  { %v223_v59 = vsub.f32 %v94_v9, %v183_v51  ;;  %v716_v50 = vld [vmem:[#allocation11 + $0x160] sm:$0xff]  ;;  %v713_v51 = vld [vmem:[#allocation11 + $0x148] sm:$0xff] }
  0xd0   :  { %v190_v60 = vrot.slane %v153_v55, %v3087_v40  ;;  %v197_v61 = vrot.slane %v153_v55, %v3090_v41  ;;  %v204_v62 = vrot.slane %v153_v55, %v3093_v42  ;;  %v211_v63 = vrot.slane %v153_v55, %v3096_v43  ;;  %v474_v55 = vld [vmem:[#allocation9 + $0x50] sm:$0xff] }
  0xd1   :  { %v3108_v0 = vmul.f32 %v236_v45, %v220_v56  ;;  %v3110_v1 = vmul.f32 %v244_v53, %v221_v57  ;;  %v3112_v2 = vmul.f32 %v243_v46, %v222_v58  ;;  %v3114_v4 = vmul.f32 %v245_v54, %v223_v59  ;;  %v708_v56 = vld [vmem:[#allocation11 + $0x120] sm:$0xff]  ;;  %v705_v57 = vld [vmem:[#allocation11 + $0x108] sm:$0xff] }
  0xd2   :  { %v224_v6 = vsub.f32 %v3072_v11, %v190_v60  ;;  %v225_v7 = vsub.f32 %v3074_v12, %v197_v61  ;;  %v226_v8 = vsub.f32 %v97_v14, %v204_v62  ;;  %v227_v9 = vsub.f32 %v98_v15, %v211_v63  ;;  %v473_v58 = vld [vmem:[#allocation9 + $0x48] sm:$0xff]  ;;  %v704_v59 = vld [vmem:[#allocation11 + $0x100] sm:$0xff] }
  0xd3   :  { %v258_v10 = vmul.f32 %v3108_v0, %v3108_v0  ;;  %v259_v13 = vmul.f32 %v3110_v1, %v3110_v1  ;;  %v260_v16 = vmul.f32 %v3112_v2, %v3112_v2  ;;  %v261_v17 = vmul.f32 %v3114_v4, %v3114_v4  ;;  %v701_v60 = vld [vmem:[#allocation11 + $0xe8] sm:$0xff]  ;;  %v472_v61 = vld [vmem:[#allocation9 + $0x40] sm:$0xff] }
  0xd4   :  { %v3126_v18 = vmul.f32 %v236_v45, %v224_v6  ;;  %v3128_v19 = vmul.f32 %v244_v53, %v225_v7  ;;  %v3130_v11 = vmul.f32 %v243_v46, %v226_v8  ;;  %v3132_v12 = vmul.f32 %v245_v54, %v227_v9  ;;  %v721_v45 = vld [vmem:[#allocation11 + $0x188] sm:$0xff]  ;;  %v712_v53 = vld [vmem:[#allocation11 + $0x140] sm:$0xff]  ;;  %v471_v6 = vld [vmem:[#allocation9 + $0x38] sm:$0xff] }
  0xd5   :  { %v274_v14 = vcombine.low %v258_v10, %v259_v13  ;;  %v275_v15 = vcombine.low %v260_v16, %v261_v17  ;;  %764 = vmatprep.subr.mxu1 %v721_v45  ;;  %v477_v46 = vld [vmem:[#allocation9 + $0x68] sm:$0xff]  ;;  %v700_v62 = vld [vmem:[#allocation11 + $0xe0] sm:$0xff]  ;;  %v470_v9 = vld [vmem:[#allocation9 + $0x30] sm:$0xff] }
  0xd6   :  { %v262_v20 = vmul.f32 %v3126_v18, %v3126_v18  ;;  %v263_v21 = vmul.f32 %v3128_v19, %v3128_v19  ;;  %v264_v22 = vmul.f32 %v3130_v11, %v3130_v11  ;;  %v265_v23 = vmul.f32 %v3132_v12, %v3132_v12  ;;  %2694 = vmatprep.subr.mxu0 %v477_v46  ;;  %v709_v54 = vld [vmem:[#allocation11 + $0x128] sm:$0xff]  ;;  %v696_v7 = vld [vmem:[#allocation11 + $0xc0] sm:$0xff] }
  0xd7   :  { %v282_v25 = vrot.slane %v274_v14, %v3070_v5  ;;  %v289_v26 = vrot.slane %v275_v15, %v3070_v5  ;;  %765 = vmatpush1.msra.mxu1 %v720_v47  ;;  %2695 = vmatpush3.msra.mxu0 %v477_v46  ;;  %v697_v63 = vld [vmem:[#allocation11 + $0xc8] sm:$0xff]  ;;  %v692_v10 = vld [vmem:[#allocation11 + $0xa0] sm:$0xff]  ;;  %v400_v46 = vcombine.high %v2655_v44, %v2655_v44 }
  0xd8   :  { %v291_v27 = vcombine.low %v262_v20, %v263_v21  ;;  %v292_v28 = vcombine.low %v264_v22, %v265_v23  ;;  %766 = vmatprep.subr.mxu1 %v717_v48  ;;  %2696 = vmatprep.subr.mxu0 %v476_v49  ;;  %v693_v8 = vld [vmem:[#allocation11 + $0xa8] sm:$0xff]  ;;  %v688_v17 = vld [vmem:[#allocation11 + $0x80] sm:$0xff]  ;;  %v467_v22 = vld [vmem:[#allocation9 + $0x18] sm:$0xff]  ;;  %v407_v48 = vrot.slane %v2655_v44, %v3070_v5 }
  0xd9   :  { %v290_v29 = vcombine.low %v282_v25, %v289_v26  ;;  %767 = vmatpush1.msra.mxu1 %v716_v50  ;;  %2697 = vmatpush3.msra.mxu0 %v476_v49  ;;  %v689_v13 = vld [vmem:[#allocation11 + $0x88] sm:$0xff]  ;;  %v468_v15 = vld [vmem:[#allocation9 + $0x20] sm:$0xff]  ;;  %v466_v26 = vld [vmem:[#allocation9 + $0x10] sm:$0xff]  ;;  %v414_v49 = vrot.slane %v400_v46, %v3070_v5 }
  0xda   :  { %v299_v30 = vrot.slane %v291_v27, %v3070_v5  ;;  %v306_v31 = vrot.slane %v292_v28, %v3070_v5  ;;  %768 = vmatprep.subr.mxu1 %v713_v51  ;;  %2698 = vmatprep.subr.mxu0 %v475_v52  ;;  %v469_v16 = vld [vmem:[#allocation9 + $0x28] sm:$0xff]  ;;  %v684_v20 = vld [vmem:[#allocation11 + $0x60] sm:$0xff]  ;;  %v734_v44 = vld [vmem:[#allocation11 + $0x1f0] sm:$0xff] }
  0xdb   :  { %310 = vadd.xlane.f32.xlu1 %v290_v29  ;;  %769 = vmatpush1.msra.mxu1 %v712_v53  ;;  %v685_v14 = vld [vmem:[#allocation11 + $0x68] sm:$0xff]  ;;  %v680_v23 = vld [vmem:[#allocation11 + $0x40] sm:$0xff]  ;;  %v415_v53 = vcombine.high %v407_v48, %v407_v48 }
  0xdc   :  { %v307_v32 = vcombine.low %v299_v30, %v306_v31  ;;  %2699 = vmatpush3.msra.mxu0 %v475_v52  ;;  %770 = vmatprep.subr.mxu1 %v709_v54  ;;  %v681_v21 = vld [vmem:[#allocation11 + $0x48] sm:$0xff]  ;;  %v676_v27 = vld [vmem:[#allocation11 + $0x20] sm:$0xff]  ;;  %v416_v54 = vcombine.high %v414_v49, %v414_v49 }
  0xdd   :  { %2700 = vmatprep.subr.mxu0 %v474_v55  ;;  %771 = vmatpush1.msra.mxu1 %v708_v56  ;;  %v677_v25 = vld [vmem:[#allocation11 + $0x28] sm:$0xff]  ;;  %v672_v30 = vld [vmem:[#allocation11] sm:$0xff] }
  0xde   :  { %2701 = vmatpush3.msra.mxu0 %v474_v55  ;;  %772 = vmatprep.subr.mxu1 %v705_v57  ;;  %v673_v28 = vld [vmem:[#allocation11 + $0x8] sm:$0xff]  ;;  %v464_v31 = vld [vmem:[#allocation9] sm:$0xff] }
  0xdf   :  { %312 = vadd.xlane.f32.xlu1 %v307_v32  ;;  %2702 = vmatprep.subr.mxu0 %v473_v58  ;;  %v465_v29 = vld [vmem:[#allocation9 + $0x8] sm:$0xff]  ;;  %v735_v32 = vld [vmem:[#allocation11 + $0x1f8] sm:$0xff]  ;;  %v3198_v46 = vld [vmem:[#allocation12 + $0x1a0] sm:$0xff] }
  0xe0   :  { %773 = vmatpush1.msra.mxu1 %v704_v59  ;;  %2703 = vmatpush3.msra.mxu0 %v473_v58  ;;  %v2656_v45 = vld [vmem:[%s4104_s2] ss:$0 sm:$0xff] }
  0xe1   :  { %774 = vmatprep.subr.mxu1 %v701_v60  ;;  %2704 = vmatprep.subr.mxu0 %v472_v61  ;;  %v435_v47 = vcombine.high %v2656_v45, %v2656_v45  ;;  %v442_v50 = vrot.slane %v2656_v45, %v3070_v5  ;;  %v731_v45 = vld [vmem:[#allocation11 + $0x1d8] sm:$0xff] }
  0xe2   :  { %775 = vmatpush1.msra.mxu1 %v700_v62  ;;  %2705 = vmatpush3.msra.mxu0 %v472_v61 }
  0xe3   :  { %776 = vmatprep.subr.mxu1 %v697_v63  ;;  %2706 = vmatprep.subr.mxu0 %v471_v6  ;;  %v449_v51 = vrot.slane %v435_v47, %v3070_v5  ;;  %v450_v59 = vcombine.high %v442_v50, %v442_v50  ;;  %v730_v47 = vld [vmem:[#allocation11 + $0x1d0] sm:$0xff] }
  0xe4   :  { %777 = vmatpush1.msra.mxu1 %v696_v7  ;;  %2707 = vmatpush3.msra.mxu0 %v471_v6 }
  0xe5   :  { %778 = vmatprep.subr.mxu1 %v693_v8  ;;  %2708 = vmatprep.subr.mxu0 %v470_v9  ;;  %v451_v60 = vcombine.high %v449_v51, %v449_v51 }
  0xe6   :  { %779 = vmatpush1.msra.mxu1 %v692_v10  ;;  %2709 = vmatpush3.msra.mxu0 %v470_v9 }
  0xe7   :  { %780 = vmatprep.subr.mxu1 %v689_v13  ;;  %2710 = vmatprep.subr.mxu0 %v469_v16 }
  0xe8   :  { %781 = vmatpush1.msra.mxu1 %v688_v17  ;;  %2711 = vmatpush3.msra.mxu0 %v469_v16 }
  0xe9   :  { %782 = vmatprep.subr.mxu1 %v685_v14  ;;  %2712 = vmatprep.subr.mxu0 %v468_v15 }
  0xea   :  { %783 = vmatpush1.msra.mxu1 %v684_v20  ;;  %2713 = vmatpush3.msra.mxu0 %v468_v15 }
  0xeb   :  { %784 = vmatprep.subr.mxu1 %v681_v21  ;;  %2714 = vmatprep.subr.mxu0 %v467_v22 }
  0xec   :  { %785 = vmatpush1.msra.mxu1 %v680_v23  ;;  %2715 = vmatpush3.msra.mxu0 %v467_v22 }
  0xed   :  { %786 = vmatprep.subr.mxu1 %v677_v25  ;;  %2716 = vmatprep.subr.mxu0 %v466_v26 }
  0xee   :  { %787 = vmatpush1.msra.mxu1 %v676_v27  ;;  %2717 = vmatpush3.msra.mxu0 %v466_v26 }
  0xef   :  { %788 = vmatprep.subr.mxu1 %v673_v28  ;;  %2718 = vmatprep.subr.mxu0 %v465_v29 }
  0xf0   :  { %789 = vmatpush1.msra.mxu1 %v672_v30  ;;  %2719 = vmatpush3.msra.mxu0 %v465_v29 }
  0xf1   :  { %2720 = vmatprep.subr.mxu0 %v464_v31  ;;  %1076 = vmatprep.subr.mxu1 %v3146_v33 }
  0xf2   :  { %2721 = vmatpush3.msra.mxu0 %v464_v31 }
  0xf3   :  { %835 = vmatprep.subr.mxu0 %v735_v32 }
 0x164   :  { %v311_v34 = vpop.xlane.xlu1 %310 }
 0x165   :  { %v314_v35 = vmul.f32 0.03125, %v311_v34  ;;  %v3181_v34 = vld [vmem:[#allocation12 + $0x1c8] sm:$0xff] }
 0x167   :  { %v316_v36 = vadd.f32 1e-12, %v314_v35  ;;  %v3185_v35 = vld [vmem:[#allocation12 + $0x1c0] sm:$0xff] }
 0x168   :  { %v313_v37 = vpop.xlane.xlu1 %312 }
 0x169   :  { %2741 = vrsqrt.f32 %v316_v36  ;;  %v315_v38 = vmul.f32 0.03125, %v313_v37 }
 0x16b   :  { %v317_v39 = vadd.f32 1e-12, %v315_v38  ;;  %v3191_v38 = vld [vmem:[#allocation12 + $0x1a8] sm:$0xff] }
 0x16d   :  { %2743 = vrsqrt.f32 %v317_v39 }
 0x176   :  { %v2742_v52 = vpop.eup %2741 }
 0x177   :  { %v328_v55 = vrot.slane %v2742_v52, %v3087_v40  ;;  %v335_v56 = vrot.slane %v2742_v52, %v3090_v41  ;;  %v342_v57 = vrot.slane %v2742_v52, %v3093_v42  ;;  %v349_v58 = vrot.slane %v2742_v52, %v3096_v43  ;;  %v3208_v52 = vld [vmem:[#allocation12 + $0x168] sm:$0xff] }
 0x179   :  { %v386_v61 = vmul.f32 %v328_v55, %v3108_v0  ;;  %v387_v62 = vmul.f32 %v335_v56, %v3110_v1  ;;  %v388_v63 = vmul.f32 %v342_v57, %v3112_v2  ;;  %v389_v6 = vmul.f32 %v349_v58, %v3114_v4  ;;  %v722_v55 = vld [vmem:[#allocation11 + $0x190] sm:$0xff]  ;;  %v3214_v56 = vld [vmem:[#allocation12 + $0x148] sm:$0xff]  ;;  %v719_v57 = vld [vmem:[#allocation11 + $0x178] sm:$0xff] }
 0x17a   :  { %v2744_v7 = vpop.eup %2743  ;;  %v3217_v58 = vld [vmem:[#allocation12 + $0x140] sm:$0xff] }
 0x17b   :  { %v421_v8 = vmul.f32 %v407_v48, %v386_v61  ;;  %v422_v9 = vmul.f32 %v415_v53, %v387_v62  ;;  %v423_v10 = vmul.f32 %v414_v49, %v388_v63  ;;  %v424_v13 = vmul.f32 %v416_v54, %v389_v6  ;;  %v715_v61 = vld [vmem:[#allocation11 + $0x158] sm:$0xff]  ;;  %v3223_v62 = vld [vmem:[#allocation12 + $0x120] sm:$0xff]  ;;  %v714_v63 = vld [vmem:[#allocation11 + $0x150] sm:$0xff] }
 0x17c   :  { %v356_v16 = vrot.slane %v2744_v7, %v3087_v40  ;;  %v363_v17 = vrot.slane %v2744_v7, %v3090_v41  ;;  %v370_v14 = vrot.slane %v2744_v7, %v3093_v42  ;;  %v377_v15 = vrot.slane %v2744_v7, %v3096_v43  ;;  %v3226_v6 = vld [vmem:[#allocation12 + $0x108] sm:$0xff]  ;;  %v711_v7 = vld [vmem:[#allocation11 + $0x138] sm:$0xff] }
 0x17d   :  { %v456_v0 = vadd.f32 %v442_v50, %v421_v8  ;;  %v457_v20 = vadd.f32 %v450_v59, %v422_v9  ;;  %v458_v1 = vadd.f32 %v449_v51, %v423_v10  ;;  %v459_v21 = vadd.f32 %v451_v60, %v424_v13  ;;  %v3229_v8 = vld [vmem:[#allocation12 + $0x100] sm:$0xff]  ;;  %v710_v9 = vld [vmem:[#allocation11 + $0x130] sm:$0xff]  ;;  %v3232_v10 = vld [vmem:[#allocation12 + $0xe8] sm:$0xff] }
 0x17e   :  { %v390_v2 = vmul.f32 %v356_v16, %v3126_v18  ;;  %v391_v4 = vmul.f32 %v363_v17, %v3128_v19  ;;  %v392_v22 = vmul.f32 %v370_v14, %v3130_v11  ;;  %v393_v23 = vmul.f32 %v377_v15, %v3132_v12  ;;  %v3179_v19 = vld [vmem:[#allocation12 + $0x1e0] sm:$0xff]  ;;  %v707_v13 = vld [vmem:[#allocation11 + $0x118] sm:$0xff]  ;;  %v706_v17 = vld [vmem:[#allocation11 + $0x110] sm:$0xff] }
 0x17f   :  { %v495_v25 = vcombine.low %v456_v0, %v457_v20  ;;  %v496_v40 = vcombine.low %v458_v1, %v459_v21  ;;  %v3235_v16 = vld [vmem:[#allocation12 + $0xe0] sm:$0xff]  ;;  %v3238_v14 = vld [vmem:[#allocation12 + $0xc8] sm:$0xff]  ;;  %v703_v15 = vld [vmem:[#allocation11 + $0xf8] sm:$0xff] }
 0x180   :  { %v425_v26 = vmul.f32 %v407_v48, %v390_v2  ;;  %v426_v41 = vmul.f32 %v415_v53, %v391_v4  ;;  %v427_v27 = vmul.f32 %v414_v49, %v392_v22  ;;  %v428_v42 = vmul.f32 %v416_v54, %v393_v23  ;;  %v3202_v48 = vld [vmem:[#allocation12 + $0x188] sm:$0xff]  ;;  %v727_v49 = vld [vmem:[#allocation11 + $0x1b8] sm:$0xff]  ;;  %v3211_v54 = vld [vmem:[#allocation12 + $0x160] sm:$0xff] }
 0x181   :  { %v503_v43 = vrot.slane %v495_v25, %v3070_v5  ;;  %v510_v28 = vrot.slane %v496_v40, %v3070_v5  ;;  %v723_v53 = vld [vmem:[#allocation11 + $0x198] sm:$0xff]  ;;  %v3241_v0 = vld [vmem:[#allocation12 + $0xc0] sm:$0xff]  ;;  %v702_v20 = vld [vmem:[#allocation11 + $0xf0] sm:$0xff] }
 0x182   :  { %v460_v29 = vadd.f32 %v442_v50, %v425_v26  ;;  %v461_v30 = vadd.f32 %v450_v59, %v426_v41  ;;  %v462_v31 = vadd.f32 %v449_v51, %v427_v27  ;;  %v463_v18 = vadd.f32 %v451_v60, %v428_v42  ;;  %v3205_v50 = vld [vmem:[#allocation12 + $0x180] sm:$0xff]  ;;  %v726_v51 = vld [vmem:[#allocation11 + $0x1b0] sm:$0xff]  ;;  %v3220_v60 = vld [vmem:[#allocation12 + $0x128] sm:$0xff]  ;;  %4225 = vst [vmem:[#allocation19_spill] sm:$0xff] %v3241_v0 }
 0x183   :  { %v3177_v32 = vcombine.low %v503_v43, %v510_v28  ;;  %v718_v59 = vld [vmem:[#allocation11 + $0x170] sm:$0xff]  ;;  %v3244_v1 = vld [vmem:[#allocation12 + $0xa8] sm:$0xff]  ;;  %v699_v21 = vld [vmem:[#allocation11 + $0xd8] sm:$0xff] }
 0x184   :  { %v512_v11 = vcombine.low %v460_v29, %v461_v30  ;;  %v513_v12 = vcombine.low %v462_v31, %v463_v18  ;;  %4226 = vst [vmem:[#allocation20_spill] sm:$0xff] %v3244_v1  ;;  %v3247_v2 = vld [vmem:[#allocation12 + $0xa0] sm:$0xff]  ;;  %v698_v4 = vld [vmem:[#allocation11 + $0xd0] sm:$0xff]  ;;  %v3250_v22 = vld [vmem:[#allocation12 + $0x88] sm:$0xff] }
 0x185   :  { %2722 = vmatprep.mubr.f32.mxu0 %v3177_v32  ;;  %823 = vmatmul.mubr.f32.vlgmr.msra.gmra.mxu1 %v3177_v32  ;;  %4227 = vst [vmem:[#allocation21_spill] sm:$0xff] %v3247_v2  ;;  %4228 = vst [vmem:[#allocation22_spill] sm:$0xff] %v3250_v22  ;;  %v695_v23 = vld [vmem:[#allocation11 + $0xb8] sm:$0xff]  ;;  %v3253_v25 = vld [vmem:[#allocation12 + $0x80] sm:$0xff] }
 0x186   :  { %828 = vmatprep.mubr.f32.mxu1 %v4111_v24  ;;  %v520_v36 = vrot.slane %v512_v11, %v3070_v5  ;;  %v527_v37 = vrot.slane %v513_v12, %v3070_v5  ;;  %1077 = vmatpush1.msra.mxu1 %v3179_v19  ;;  %4229 = vst [vmem:[#allocation23_spill] sm:$0xff] %v3253_v25  ;;  %v694_v40 = vld [vmem:[#allocation11 + $0xb0] sm:$0xff]  ;;  %v3256_v26 = vld [vmem:[#allocation12 + $0x68] sm:$0xff]  ;;  %v691_v41 = vld [vmem:[#allocation11 + $0x98] sm:$0xff] }
 0x187   :  { %1078 = vmatprep.subr.mxu1 %v3181_v34  ;;  %4230 = vst [vmem:[#allocation24_spill] sm:$0xff] %v3256_v26  ;;  %v3259_v27 = vld [vmem:[#allocation12 + $0x60] sm:$0xff]  ;;  %v690_v42 = vld [vmem:[#allocation11 + $0x90] sm:$0xff]  ;;  %v3262_v43 = vld [vmem:[#allocation12 + $0x48] sm:$0xff] }
 0x188   :  { %v3194_v39 = vcombine.low %v520_v36, %v527_v37  ;;  %1079 = vmatpush1.msra.mxu1 %v3185_v35  ;;  %4231 = vst [vmem:[#allocation25_spill] sm:$0xff] %v3259_v27  ;;  %4232 = vst [vmem:[#allocation26_spill] sm:$0xff] %v3262_v43  ;;  %v687_v28 = vld [vmem:[#allocation11 + $0x78] sm:$0xff]  ;;  %v3265_v29 = vld [vmem:[#allocation12 + $0x40] sm:$0xff] }
 0x189   :  { %1080 = vmatprep.subr.mxu1 %v3191_v38  ;;  %4233 = vst [vmem:[#allocation27_spill] sm:$0xff] %v3265_v29  ;;  %v686_v30 = vld [vmem:[#allocation11 + $0x70] sm:$0xff]  ;;  %v3268_v31 = vld [vmem:[#allocation12 + $0x28] sm:$0xff]  ;;  %v683_v18 = vld [vmem:[#allocation11 + $0x58] sm:$0xff] }
 0x18a   :  { %2723 = vmatmul.mubr.f32.vlgmr.msra.gmra.mxu0 %v3194_v39  ;;  %829 = vmatmul.mubr.f32.gmra.mxu1 %v3194_v39  ;;  %4234 = vst [vmem:[#allocation28_spill] sm:$0xff] %v3268_v31  ;;  %v3271_v11 = vld [vmem:[#allocation12 + $0x20] sm:$0xff]  ;;  %v682_v12 = vld [vmem:[#allocation11 + $0x50] sm:$0xff]  ;;  %v3274_v36 = vld [vmem:[#allocation12 + $0x8] sm:$0xff] }
 0x18b   :  { %836 = vmatpush1.msra.mxu0 %v734_v44  ;;  %899 = vmatprep.mubr.f32.mxu0 %v4111_v24  ;;  %4235 = vst [vmem:[#allocation29_spill] sm:$0xff] %v3271_v11  ;;  %4236 = vst [vmem:[#allocation30_spill] sm:$0xff] %v3274_v36  ;;  %v679_v37 = vld [vmem:[#allocation11 + $0x38] sm:$0xff]  ;;  %v3277_v44 = vld [vmem:[#allocation12] sm:$0xff] }
 0x18c   :  { %837 = vmatprep.subr.mxu0 %v731_v45  ;;  %1081 = vmatpush1.msra.mxu1 %v3198_v46  ;;  %4237 = vst [vmem:[#allocation31_spill] sm:$0xff] %v3277_v44  ;;  %v678_v45 = vld [vmem:[#allocation11 + $0x30] sm:$0xff] }
 0x18d   :  { %838 = vmatpush1.msra.mxu0 %v730_v47  ;;  %1082 = vmatprep.subr.mxu1 %v3202_v48  ;;  %v675_v47 = vld [vmem:[#allocation11 + $0x18] sm:$0xff] }
 0x18e   :  { %839 = vmatprep.subr.mxu0 %v727_v49  ;;  %1083 = vmatpush1.msra.mxu1 %v3205_v50  ;;  %v3281_v49 = vld [vmem:[#allocation2] sm:$0x3] }
 0x18f   :  { %840 = vmatpush1.msra.mxu0 %v726_v51  ;;  %1084 = vmatprep.subr.mxu1 %v3208_v52  ;;  %v674_v51 = vld [vmem:[#allocation11 + $0x10] sm:$0xff] }
 0x190   :  { %841 = vmatprep.subr.mxu0 %v723_v53  ;;  %1085 = vmatpush1.msra.mxu1 %v3211_v54  ;;  %v3284_v53 = vld [vmem:[#allocation12 + $0x1f8] sm:$0xff] }
 0x191   :  { %842 = vmatpush1.msra.mxu0 %v722_v55  ;;  %1086 = vmatprep.subr.mxu1 %v3214_v56  ;;  %4238 = vst [vmem:[#allocation32_spill] sm:$0xff] %v3284_v53  ;;  %v3287_v55 = vld [vmem:[#allocation12 + $0x1f0] sm:$0xff] }
 0x192   :  { %843 = vmatprep.subr.mxu0 %v719_v57  ;;  %1087 = vmatpush1.msra.mxu1 %v3217_v58  ;;  %v3290_v57 = vld [vmem:[#allocation12 + $0x1d8] sm:$0xff] }
 0x193   :  { %844 = vmatpush1.msra.mxu0 %v718_v59  ;;  %1088 = vmatprep.subr.mxu1 %v3220_v60  ;;  %v3295_v59 = vld [vmem:[#allocation12 + $0x1d0] sm:$0xff] }
 0x194   :  { %845 = vmatprep.subr.mxu0 %v715_v61  ;;  %1089 = vmatpush1.msra.mxu1 %v3223_v62  ;;  %v3299_v61 = vld [vmem:[#allocation12 + $0x1b8] sm:$0xff] }
 0x195   :  { %846 = vmatpush1.msra.mxu0 %v714_v63  ;;  %1090 = vmatprep.subr.mxu1 %v3226_v6  ;;  %v3302_v63 = vld [vmem:[#allocation12 + $0x1b0] sm:$0xff] }
 0x196   :  { %847 = vmatprep.subr.mxu0 %v711_v7  ;;  %1091 = vmatpush1.msra.mxu1 %v3229_v8  ;;  %v3306_v7 = vld [vmem:[#allocation12 + $0x198] sm:$0xff] }
 0x197   :  { %848 = vmatpush1.msra.mxu0 %v710_v9  ;;  %1092 = vmatprep.subr.mxu1 %v3232_v10  ;;  %v3314_v9 = vld [vmem:[#allocation12 + $0x178] sm:$0xff] }
 0x198   :  { %849 = vmatprep.subr.mxu0 %v707_v13  ;;  %1093 = vmatpush1.msra.mxu1 %v3235_v16  ;;  %v3318_v13 = vld [vmem:[#allocation12 + $0x170] sm:$0xff] }
 0x199   :  { %850 = vmatpush1.msra.mxu0 %v706_v17  ;;  %1094 = vmatprep.subr.mxu1 %v3238_v14  ;;  %v3322_v17 = vld [vmem:[#allocation12 + $0x158] sm:$0xff] }
 0x19a   :  { %851 = vmatprep.subr.mxu0 %v703_v15  ;;  %1095 = vmatpush1.msra.mxu1 %v3241_v0  ;;  %v3330_v15 = vld [vmem:[#allocation12 + $0x138] sm:$0xff] }
 0x19b   :  { %852 = vmatpush1.msra.mxu0 %v702_v20  ;;  %1096 = vmatprep.subr.mxu1 %v3244_v1  ;;  %v3334_v20 = vld [vmem:[#allocation12 + $0x130] sm:$0xff] }
 0x19c   :  { %853 = vmatprep.subr.mxu0 %v699_v21  ;;  %1097 = vmatpush1.msra.mxu1 %v3247_v2  ;;  %v3338_v21 = vld [vmem:[#allocation12 + $0x118] sm:$0xff] }
 0x19d   :  { %854 = vmatpush1.msra.mxu0 %v698_v4  ;;  %1098 = vmatprep.subr.mxu1 %v3250_v22  ;;  %v3342_v4 = vld [vmem:[#allocation12 + $0x110] sm:$0xff] }
 0x19e   :  { %855 = vmatprep.subr.mxu0 %v695_v23  ;;  %1099 = vmatpush1.msra.mxu1 %v3253_v25  ;;  %v3346_v23 = vld [vmem:[#allocation12 + $0xf8] sm:$0xff] }
 0x19f   :  { %856 = vmatpush1.msra.mxu0 %v694_v40  ;;  %1100 = vmatprep.subr.mxu1 %v3256_v26  ;;  %v3350_v40 = vld [vmem:[#allocation12 + $0xf0] sm:$0xff] }
 0x1a0   :  { %857 = vmatprep.subr.mxu0 %v691_v41  ;;  %1101 = vmatpush1.msra.mxu1 %v3259_v27  ;;  %v3354_v41 = vld [vmem:[#allocation12 + $0xd8] sm:$0xff] }
 0x1a1   :  { %858 = vmatpush1.msra.mxu0 %v690_v42  ;;  %1102 = vmatprep.subr.mxu1 %v3262_v43  ;;  %v3358_v42 = vld [vmem:[#allocation12 + $0xd0] sm:$0xff] }
 0x1a2   :  { %859 = vmatprep.subr.mxu0 %v687_v28  ;;  %1103 = vmatpush1.msra.mxu1 %v3265_v29  ;;  %4239 = vst [vmem:[#allocation33_spill] sm:$0xff] %v3358_v42  ;;  %v3362_v28 = vld [vmem:[#allocation12 + $0xb8] sm:$0xff] }
 0x1a3   :  { %860 = vmatpush1.msra.mxu0 %v686_v30  ;;  %1104 = vmatprep.subr.mxu1 %v3268_v31  ;;  %4240 = vst [vmem:[#allocation34_spill] sm:$0xff] %v3362_v28  ;;  %v3366_v30 = vld [vmem:[#allocation12 + $0xb0] sm:$0xff] }
 0x1a4   :  { %861 = vmatprep.subr.mxu0 %v683_v18  ;;  %1105 = vmatpush1.msra.mxu1 %v3271_v11  ;;  %4241 = vst [vmem:[#allocation35_spill] sm:$0xff] %v3366_v30  ;;  %v3370_v18 = vld [vmem:[#allocation12 + $0x98] sm:$0xff] }
 0x1a5   :  { %862 = vmatpush1.msra.mxu0 %v682_v12  ;;  %1106 = vmatprep.subr.mxu1 %v3274_v36  ;;  %4242 = vst [vmem:[#allocation36_spill] sm:$0xff] %v3370_v18  ;;  %v3374_v12 = vld [vmem:[#allocation12 + $0x90] sm:$0xff] }
 0x1a6   :  { %863 = vmatprep.subr.mxu0 %v679_v37  ;;  %1107 = vmatpush1.msra.mxu1 %v3277_v44  ;;  %4243 = vst [vmem:[#allocation37_spill] sm:$0xff] %v3374_v12  ;;  %v3378_v37 = vld [vmem:[#allocation12 + $0x78] sm:$0xff] }
 0x1a7   :  { %864 = vmatpush1.msra.mxu0 %v678_v45  ;;  %1140 = vmatprep.mubr.f32.mxu1 %v4111_v24  ;;  %4244 = vst [vmem:[#allocation38_spill] sm:$0xff] %v3378_v37  ;;  %v3382_v45 = vld [vmem:[#allocation12 + $0x70] sm:$0xff] }
 0x1a8   :  { %865 = vmatprep.subr.mxu0 %v675_v47  ;;  %1141 = vmatmul.mubr.f32.vlgmr.msra.gmra.mxu1 %v3281_v49  ;;  %4245 = vst [vmem:[#allocation39_spill] sm:$0xff] %v3382_v45  ;;  %v3386_v47 = vld [vmem:[#allocation12 + $0x58] sm:$0xff] }
 0x1a9   :  { %866 = vmatpush1.msra.mxu0 %v674_v51  ;;  %1264 = vmatprep.subr.mxu1 %v3146_v33  ;;  %4246 = vst [vmem:[#allocation40_spill] sm:$0xff] %v3386_v47  ;;  %v3390_v51 = vld [vmem:[#allocation12 + $0x50] sm:$0xff] }
 0x1aa   :  { %900 = vmatmul.mubr.f32.vlgmr.msra.gmra.mxu0 %v3177_v32  ;;  %1147 = vmatprep.subr.mxu0 %v3284_v53  ;;  %v3311_v32 = vld [vmem:[#allocation12 + $0x190] sm:$0xff]  ;;  %4247 = vst [vmem:[#allocation41_spill] sm:$0xff] %v3390_v51 }
 0x1ab   :  { %1148 = vmatpush1.msra.mxu0 %v3287_v55  ;;  %905 = vmatprep.mubr.f32.mxu0 %v4111_v24 }
 0x1ac   :  { %1149 = vmatprep.subr.mxu0 %v3290_v57  ;;  %1265 = vmatpush1.msra.mxu1 %v3179_v19 }
 0x1ad   :  { %1150 = vmatpush1.msra.mxu0 %v3295_v59  ;;  %1266 = vmatprep.subr.mxu1 %v3181_v34 }
 0x1ae   :  { %906 = vmatmul.mubr.f32.gmra.mxu0 %v3194_v39  ;;  %1151 = vmatprep.subr.mxu0 %v3299_v61  ;;  %v3326_v39 = vld [vmem:[#allocation12 + $0x150] sm:$0xff] }
 0x1af   :  { %1152 = vmatpush1.msra.mxu0 %v3302_v63  ;;  %1211 = vmatprep.mubr.f32.mxu0 %v4111_v24  ;;  %v3394_v24 = vld [vmem:[#allocation12 + $0x38] sm:$0xff] }
 0x1b0   :  { %1153 = vmatprep.subr.mxu0 %v3306_v7  ;;  %1267 = vmatpush1.msra.mxu1 %v3185_v35  ;;  %4248 = vst [vmem:[#allocation42_spill] sm:$0xff] %v3394_v24 }
 0x1b1   :  { %1154 = vmatpush1.msra.mxu0 %v3311_v32  ;;  %1268 = vmatprep.subr.mxu1 %v3191_v38 }
 0x1b2   :  { %1155 = vmatprep.subr.mxu0 %v3314_v9  ;;  %1269 = vmatpush1.msra.mxu1 %v3198_v46 }
 0x1b3   :  { %1156 = vmatpush1.msra.mxu0 %v3318_v13  ;;  %1270 = vmatprep.subr.mxu1 %v3202_v48 }
 0x1b4   :  { %1157 = vmatprep.subr.mxu0 %v3322_v17  ;;  %1271 = vmatpush1.msra.mxu1 %v3205_v50 }
 0x1b5   :  { %1158 = vmatpush1.msra.mxu0 %v3326_v39  ;;  %1272 = vmatprep.subr.mxu1 %v3208_v52 }
 0x1b6   :  { %1159 = vmatprep.subr.mxu0 %v3330_v15  ;;  %1273 = vmatpush1.msra.mxu1 %v3211_v54 }
 0x1b7   :  { %1160 = vmatpush1.msra.mxu0 %v3334_v20  ;;  %1274 = vmatprep.subr.mxu1 %v3214_v56 }
 0x1b8   :  { %1161 = vmatprep.subr.mxu0 %v3338_v21  ;;  %1275 = vmatpush1.msra.mxu1 %v3217_v58 }
 0x1b9   :  { %1162 = vmatpush1.msra.mxu0 %v3342_v4  ;;  %1276 = vmatprep.subr.mxu1 %v3220_v60 }
 0x1ba   :  { %1163 = vmatprep.subr.mxu0 %v3346_v23  ;;  %1277 = vmatpush1.msra.mxu1 %v3223_v62 }
 0x1bb   :  { %1164 = vmatpush1.msra.mxu0 %v3350_v40  ;;  %1278 = vmatprep.subr.mxu1 %v3226_v6 }
 0x1bc   :  { %1165 = vmatprep.subr.mxu0 %v3354_v41  ;;  %1279 = vmatpush1.msra.mxu1 %v3229_v8 }
 0x1bd   :  { %1166 = vmatpush1.msra.mxu0 %v3358_v42  ;;  %1280 = vmatprep.subr.mxu1 %v3232_v10 }
 0x1be   :  { %1167 = vmatprep.subr.mxu0 %v3362_v28  ;;  %1281 = vmatpush1.msra.mxu1 %v3235_v16 }
 0x1bf   :  { %1168 = vmatpush1.msra.mxu0 %v3366_v30  ;;  %1282 = vmatprep.subr.mxu1 %v3238_v14 }
 0x1c0   :  { %1169 = vmatprep.subr.mxu0 %v3370_v18  ;;  %1283 = vmatpush1.msra.mxu1 %v3241_v0  ;;  %v3398_v0 = vld [vmem:[#allocation12 + $0x30] sm:$0xff] }
 0x1c1   :  { %1170 = vmatpush1.msra.mxu0 %v3374_v12  ;;  %1284 = vmatprep.subr.mxu1 %v3244_v1  ;;  %4249 = vst [vmem:[#allocation43_spill] sm:$0xff] %v3398_v0  ;;  %v3402_v1 = vld [vmem:[#allocation12 + $0x18] sm:$0xff] }
 0x1c2   :  { %1171 = vmatprep.subr.mxu0 %v3378_v37  ;;  %1285 = vmatpush1.msra.mxu1 %v3247_v2  ;;  %4250 = vst [vmem:[#allocation44_spill] sm:$0xff] %v3402_v1  ;;  %v3406_v2 = vld [vmem:[#allocation12 + $0x10] sm:$0xff] }
 0x1c3   :  { %1172 = vmatpush1.msra.mxu0 %v3382_v45  ;;  %1286 = vmatprep.subr.mxu1 %v3250_v22  ;;  %4251 = vst [vmem:[#allocation45_spill] sm:$0xff] %v3406_v2 }
 0x1c4   :  { %1173 = vmatprep.subr.mxu0 %v3386_v47  ;;  %1287 = vmatpush1.msra.mxu1 %v3253_v25 }
 0x1c5   :  { %1174 = vmatpush1.msra.mxu0 %v3390_v51  ;;  %1288 = vmatprep.subr.mxu1 %v3256_v26 }
 0x1c6   :  { %1175 = vmatprep.subr.mxu0 %v3394_v24  ;;  %1289 = vmatpush1.msra.mxu1 %v3259_v27 }
 0x1c7   :  { %1176 = vmatpush1.msra.mxu0 %v3398_v0  ;;  %1290 = vmatprep.subr.mxu1 %v3262_v43 }
 0x1c8   :  { %1177 = vmatprep.subr.mxu0 %v3402_v1  ;;  %1291 = vmatpush1.msra.mxu1 %v3265_v29  ;;  %v4252_v29 = vmov 0.0  }
 0x1c9   :  { %1178 = vmatpush1.msra.mxu0 %v3406_v2  ;;  %1292 = vmatprep.subr.mxu1 %v3268_v31 }
 0x1ca   :  { %1212 = vmatmul.mubr.f32.vlgmr.msra.gmra.mxu0 %v3281_v49  ;;  %1335 = vmatprep.subr.mxu0 %v3284_v53  ;;  %v744_v49 = vsub.s32 1, %v3067_v3 }
 0x1cb   :  { %1336 = vmatpush1.msra.mxu0 %v3287_v55  ;;  %1293 = vmatpush1.msra.mxu1 %v3271_v11 }
 0x1cc   :  { %1337 = vmatprep.subr.mxu0 %v3290_v57  ;;  %1294 = vmatprep.subr.mxu1 %v3274_v36 }
 0x1cd   :  { %1338 = vmatpush1.msra.mxu0 %v3295_v59  ;;  %1295 = vmatpush1.msra.mxu1 %v3277_v44 }
 0x1ce   :  { %1339 = vmatprep.subr.mxu0 %v3299_v61  ;;  %1328 = vmatprep.mubr.f32.mxu1 %v4252_v29 }
 0x1cf   :  { %1340 = vmatpush1.msra.mxu0 %v3302_v63  ;;  %1399 = vmatprep.mubr.f32.mxu0 %v4252_v29  ;;  %v736_v29 = vld [vmem:[%s4108_s6] sm:$0xf] }
 0x1d0   :  { %1341 = vmatprep.subr.mxu0 %v3306_v7  ;;  %1453 = vmatprep.subr.mxu1 %v3146_v33  ;;  %v740_v33 = vsub.s32 0, %v3067_v3  ;;  %v745_v36 = vrot.slane %v736_v29, %v744_v49 }
 0x1d1   :  { %1342 = vmatpush1.msra.mxu0 %v3311_v32 }
 0x1d2   :  { %1343 = vmatprep.subr.mxu0 %v3314_v9  ;;  %v741_v44 = vrot.slane %v736_v29, %v740_v33 }
 0x1d3   :  { %1344 = vmatpush1.msra.mxu0 %v3318_v13 }
 0x1d4   :  { %1345 = vmatprep.subr.mxu0 %v3322_v17 }
 0x1d5   :  { %1346 = vmatpush1.msra.mxu0 %v3326_v39 }
 0x1d6   :  { %1347 = vmatprep.subr.mxu0 %v3330_v15 }
 0x1d7   :  { %1348 = vmatpush1.msra.mxu0 %v3334_v20 }
 0x1d8   :  { %1349 = vmatprep.subr.mxu0 %v3338_v21 }
 0x1d9   :  { %1350 = vmatpush1.msra.mxu0 %v3342_v4 }
 0x1da   :  { %1351 = vmatprep.subr.mxu0 %v3346_v23 }
 0x1db   :  { %1352 = vmatpush1.msra.mxu0 %v3350_v40 }
 0x1dc   :  { %1353 = vmatprep.subr.mxu0 %v3354_v41 }
 0x1dd   :  { %1354 = vmatpush1.msra.mxu0 %v3358_v42 }
 0x1de   :  { %1355 = vmatprep.subr.mxu0 %v3362_v28 }
 0x1df   :  { %1356 = vmatpush1.msra.mxu0 %v3366_v30 }
 0x1e0   :  { %1357 = vmatprep.subr.mxu0 %v3370_v18 }
 0x1e1   :  { %1358 = vmatpush1.msra.mxu0 %v3374_v12 }
 0x1e2   :  { %1359 = vmatprep.subr.mxu0 %v3378_v37 }
 0x1e3   :  { %1360 = vmatpush1.msra.mxu0 %v3382_v45 }
 0x1e4   :  { %1361 = vmatprep.subr.mxu0 %v3386_v47 }
 0x1e5   :  { %1362 = vmatpush1.msra.mxu0 %v3390_v51 }
 0x1e6   :  { %1363 = vmatprep.subr.mxu0 %v3394_v24 }
 0x1e7   :  { %1364 = vmatpush1.msra.mxu0 %v3398_v0 }
 0x1e8   :  { %1365 = vmatprep.subr.mxu0 %v3402_v1 }
 0x1e9   :  { %1366 = vmatpush1.msra.mxu0 %v3406_v2  ;;  %v2657_v2 = vld [vmem:[%s4106_s4] ss:$0 sm:$0xff]  ;;  %s3004_s4 = smov [#allocation14]  }
 0x1ea   :  { %1524 = vmatprep.subr.mxu0 %v3284_v53  ;;  %s2640_s6 = sshll.u32 %s3004_s4, 4  ;;  %s2641_s6 = int_to_ptr.vmem [resolvable:$true] %s2640_s6 }
 0x1eb   :  { %s2961_s10 = scalar_lea.vmem %s2641_s6, 256  ;;  %p2966_p7 = scmp.lt.s32.totalorder %s2641_s6, %s2641_s6 }
 0x1ec   :  { %p2962_p6 = scmp.ne.s32.totalorder %s2641_s6, %s2961_s10  ;;  %p2967_p8 = scmp.lt.s32.totalorder %s2961_s10, %s2961_s10 }
 0x1ee   :  { %p2968_p9 = por %p2967_p8, %p2966_p7 }
 0x1f0   :  { %p2969_p10 = pnand %p2968_p9, %p2962_p6 }
 0x245   :  { %v824_v11 = vpop.f32.mrf.mxu1 }
 0x246   :  { %v825_v31 = vadd.f32 %v824_v11, %v741_v44 }
 0x247   :  { %v826_v24 = vpop.f32.mrf.mxu1 }
 0x248   :  { %v827_v0 = vadd.f32 %v826_v24, %v745_v36 }
 0x24a   :  { %v921_v1 = vcombine.high %v825_v31, %v827_v0  ;;  %v2724_v53 = vpop.f32.mrf.mxu0  ;;  %v830_v51 = vpop.f32.mrf.mxu1 }
 0x24b   :  { %v603_v47 = vadd.f32 %v2724_v53, %v2657_v2  ;;  %v3463_v43 = vadd.f32 %v830_v51, %v741_v44  ;;  %v748_v44 = vsub.s32 2, %v3067_v3  ;;  %v752_v53 = vsub.s32 3, %v3067_v3 }
 0x24c   :  { %v597_v45 = vpop.f32.mrf.mxu0  ;;  %v832_v27 = vpop.f32.mrf.mxu1 }
 0x24d   :  { %v2659_v37 = vmul.f32 -1.442695, %v603_v47  ;;  %v598_v26 = vadd.f32 %v2657_v2, %v597_v45  ;;  %v833_v33 = vadd.f32 %v832_v27, %v745_v36  ;;  %v749_v51 = vrot.slane %v736_v29, %v748_v44 }
 0x24e   :  { %v753_v2 = vrot.slane %v736_v29, %v752_v53 }
 0x24f   :  { %2745 = vpow2.f32 %v2659_v37  ;;  %v2658_v49 = vmul.f32 -1.442695, %v598_v26  ;;  %v956_v11 = vcombine.low %v3463_v43, %v833_v33  ;;  %v957_v24 = vcombine.high %v3463_v43, %v833_v33 }
 0x250   :  { %v920_v37 = vcombine.low %v825_v31, %v827_v0 }
 0x251   :  { %2747 = vpow2.f32 %v2658_v49 }
 0x252   :  { %v3471_v42 = vrot.slane %v920_v37, %v3070_v5 }
 0x25c   :  { %v2746_v12 = vpop.eup %2745 }
 0x25d   :  { %v613_v25 = vadd.f32 1.0, %v2746_v12 }
 0x25e   :  { %v2748_v18 = vpop.eup %2747 }
 0x25f   :  { %2749 = vrcp.f32 %v613_v25  ;;  %v612_v22 = vadd.f32 1.0, %v2748_v18 }
 0x261   :  { %2751 = vrcp.f32 %v612_v22 }
 0x26a   :  { %v901_v27 = vpop.f32.mrf.mxu0 }
 0x26b   :  { %v902_v28 = vadd.f32 %v901_v27, %v749_v51  ;;  %v3476_v27 = vrot.slane %v921_v1, %v3070_v5  ;;  %v4275_v1 = vld [vmem:[#allocation27_spill] sm:$0xff] }
 0x26c   :  { %v2750_v36 = vpop.eup %2749  ;;  %v903_v45 = vpop.f32.mrf.mxu0 }
 0x26d   :  { %v619_v30 = vmul.f32 %v2750_v36, %v603_v47  ;;  %v904_v43 = vadd.f32 %v903_v45, %v753_v2  ;;  %4253 = vst [vmem:[#allocation46_spill] sm:$0xff] %v3476_v27  ;;  %v4276_v45 = vld [vmem:[#allocation41_spill] sm:$0xff]  ;;  %v4282_v27 = vld [vmem:[#allocation44_spill] sm:$0xff] }
 0x26e   :  { %v2752_v33 = vpop.eup %2751  ;;  %v907_v49 = vpop.f32.mrf.mxu0 }
 0x26f   :  { %v639_v12 = vcombine.high %v619_v30, %v619_v30  ;;  %v646_v25 = vrot.slane %v619_v30, %v3070_v5  ;;  %2662 = vst.sshfl [vmem:[#allocation3 + $0x8] sm:$0x3 pattern:$0x76325410] %v619_v30  ;;  %v618_v22 = vmul.f32 %v2752_v33, %v598_v26  ;;  %v922_v18 = vcombine.low %v902_v28, %v904_v43 }
 0x270   :  { %v923_v3 = vcombine.high %v902_v28, %v904_v43  ;;  %v908_v29 = vadd.f32 %v907_v49, %v749_v51  ;;  %v909_v44 = vpop.f32.mrf.mxu0 }
 0x271   :  { %v653_v0 = vrot.slane %v639_v12, %v3070_v5  ;;  %v654_v31 = vcombine.high %v646_v25, %v646_v25  ;;  %2663 = vst.sshfl [vmem:[#allocation3 + $0xc] sm:$0x3 pattern:$0x76325410] %v639_v12  ;;  %v622_v47 = vcombine.high %v618_v22, %v618_v22  ;;  %v629_v53 = vrot.slane %v618_v22, %v3070_v5 }
 0x272   :  { %2660 = vst.sshfl [vmem:[#allocation3] sm:$0x3 pattern:$0x76325410] %v618_v22  ;;  %v3479_v26 = vrot.slane %v922_v18, %v3070_v5  ;;  %v3482_v30 = vrot.slane %v923_v3, %v3070_v5  ;;  %v910_v28 = vadd.f32 %v909_v44, %v753_v2  ;;  %v3492_v12 = vrot.slane %v956_v11, %v3070_v5 }
 0x273   :  { %v655_v51 = vcombine.high %v653_v0, %v653_v0  ;;  %669 = vst [vmem:[#allocation3 + $0xa] sm:$0x3] %v654_v31  ;;  %v636_v36 = vrot.slane %v622_v47, %v3070_v5  ;;  %v637_v37 = vcombine.high %v629_v53, %v629_v53  ;;  %2661 = vst.sshfl [vmem:[#allocation3 + $0x4] sm:$0x3 pattern:$0x76325410] %v622_v47 }
 0x274   :  { %4254 = vst [vmem:[#allocation47_spill] sm:$0xff] %v3482_v30  ;;  %v958_v49 = vcombine.low %v908_v29, %v910_v28  ;;  %v959_v2 = vcombine.high %v908_v29, %v910_v28  ;;  %4255 = vst [vmem:[#allocation48_spill] sm:$0xff] %v3492_v12  ;;  %v3495_v25 = vrot.slane %v957_v24, %v3070_v5  ;;  %v1142_v24 = vpop.f32.mrf.mxu1  ;;  %v4280_v12 = vld [vmem:[#allocation43_spill] sm:$0xff]  ;;  %v4281_v30 = vld [vmem:[#allocation30_spill] sm:$0xff] }
 0x275   :  { %671 = vst [vmem:[#allocation3 + $0xe] sm:$0x3] %v655_v51  ;;  %v638_v33 = vcombine.high %v636_v36, %v636_v36  ;;  %665 = vst [vmem:[#allocation3 + $0x2] sm:$0x3] %v637_v37  ;;  %v952_v37 = vcombine.low %v3471_v42, %v3479_v26 }
 0x276   :  { %4256 = vst [vmem:[#allocation49_spill] sm:$0xff] %v3495_v25  ;;  %v3498_v22 = vrot.slane %v958_v49, %v3070_v5  ;;  %v3501_v18 = vrot.slane %v959_v2, %v3070_v5  ;;  %v1144_v0 = vpop.f32.mrf.mxu1  ;;  %v4278_v25 = vld [vmem:[#allocation42_spill] sm:$0xff] }
 0x277   :  { %667 = vst [vmem:[#allocation3 + $0x6] sm:$0x3] %v638_v33  ;;  %v1222_v47 = vcombine.low %v1142_v24, %v1144_v0  ;;  %v1074_v24 = vld [vmem:[#allocation2 + $0x2] sm:$0x3] }
 0x278   :  { %4257 = vst [vmem:[#allocation50_spill] sm:$0xff] %v3498_v22  ;;  %4258 = vst [vmem:[#allocation51_spill] sm:$0xff] %v3501_v18  ;;  %v4277_v18 = vld [vmem:[#allocation28_spill] sm:$0xff]  ;;  %v4279_v22 = vld [vmem:[#allocation29_spill] sm:$0xff] }
 0x279   :  { %v1230_v51 = vrot.slane %v1222_v47, %v3070_v5 }
 0x28a   :  { %v1213_v31 = vpop.f32.mrf.mxu0 }
 0x28c   :  { %v1215_v53 = vpop.f32.mrf.mxu0 }
 0x28d   :  { %v1223_v28 = vcombine.low %v1213_v31, %v1215_v53 }
 0x28f   :  { %v1237_v36 = vrot.slane %v1223_v28, %v3070_v5 }
 0x291   :  { %v1238_v33 = vcombine.low %v1230_v51, %v1237_v36 }
 0x293   :  { %v1240_v49 = vadd.f32 %v1238_v33, %v952_v37  ;;  %v4259_v33 = vld [vmem:[#allocation19_spill] sm:$0xff] }
 0x295   :  { %v2664_v2 = vmul.f32 -1.442695, %v1240_v49  ;;  %v1248_v11 = vrot.slane %v1240_v49, 6  ;;  %v4260_v49 = vld [vmem:[#allocation33_spill] sm:$0xff] }
 0x297   :  { %2753 = vpow2.f32 %v2664_v2  ;;  %v4261_v2 = vld [vmem:[#allocation20_spill] sm:$0xff] }
 0x2a4   :  { %v2754_v29 = vpop.eup %2753 }
 0x2a5   :  { %v1244_v44 = vadd.f32 1.0, %v2754_v29  ;;  %v2611_v29 = vld [vmem:[#allocation6] sm:$0x3] }
 0x2a7   :  { %2755 = vrcp.f32 %v1244_v44  ;;  %v2595_v44 = vld [vmem:[#allocation3] sm:$0x3] }
 0x2a8   :  { %2757 = vtanh.f32 %v1248_v11 }
 0x2b4   :  { %v2756_v3 = vpop.eup %2755 }
 0x2b5   :  { %v1252_v0 = vrot.slane %v2756_v3, 2  ;;  %v2758_v31 = vpop.eup %2757  ;;  %v1258_v28 = vrot.slane %v2756_v3, 4 }
 0x2b6   :  { %v1255_v53 = vmul.f32 %v2758_v31, %v2756_v3  ;;  %v4264_v31 = vld [vmem:[#allocation35_spill] sm:$0xff] }
 0x2b7   :  { %v1254_v47 = vmul.f32 %v1252_v0, %v1074_v24  ;;  %v4262_v24 = vld [vmem:[#allocation34_spill] sm:$0xff]  ;;  %v4263_v0 = vld [vmem:[#allocation21_spill] sm:$0xff] }
 0x2b9   :  { %v3515_v43 = vadd.f32 %v1255_v53, %v1254_v47  ;;  %v4265_v53 = vld [vmem:[#allocation22_spill] sm:$0xff]  ;;  %v4266_v47 = vld [vmem:[#allocation36_spill] sm:$0xff] }
 0x2bb   :  { %2759 = vtanh.f32 %v3515_v43 }
 0x2c8   :  { %v2760_v51 = vpop.eup %2759 }
 0x2c9   :  { %v1260_v36 = vmul.f32 %v2760_v51, %v1258_v28  ;;  %v4267_v28 = vld [vmem:[#allocation23_spill] sm:$0xff]  ;;  %v4268_v51 = vld [vmem:[#allocation37_spill] sm:$0xff] }
 0x2cb   :  { %1261 = vst [vmem:[#allocation5] sm:$0x3] %v1260_v36  ;;  %1329 = vmatmul.mubr.f32.vlgmr.msra.gmra.mxu1 %v1260_v36  ;;  %1400 = vmatmul.mubr.f32.vlgmr.msra.gmra.mxu0 %v1260_v36  ;;  %v4269_v36 = vld [vmem:[#allocation24_spill] sm:$0xff] }
 0x2cc   :  { %1454 = vmatpush1.msra.mxu1 %v3179_v19  ;;  %1525 = vmatpush1.msra.mxu0 %v3287_v55 }
 0x2cd   :  { %1455 = vmatprep.subr.mxu1 %v3181_v34  ;;  %1526 = vmatprep.subr.mxu0 %v3290_v57 }
 0x2ce   :  { %1456 = vmatpush1.msra.mxu1 %v3185_v35  ;;  %1527 = vmatpush1.msra.mxu0 %v3295_v59 }
 0x2cf   :  { %1457 = vmatprep.subr.mxu1 %v3191_v38  ;;  %1528 = vmatprep.subr.mxu0 %v3299_v61 }
 0x2d0   :  { %1458 = vmatpush1.msra.mxu1 %v3198_v46  ;;  %1529 = vmatpush1.msra.mxu0 %v3302_v63 }
 0x2d1   :  { %1459 = vmatprep.subr.mxu1 %v3202_v48  ;;  %1530 = vmatprep.subr.mxu0 %v3306_v7 }
 0x2d2   :  { %1460 = vmatpush1.msra.mxu1 %v3205_v50  ;;  %1531 = vmatpush1.msra.mxu0 %v3311_v32  ;;  %v2587_v3 = vld [vmem:[#allocation5] sm:$0x3] }
 0x2d3   :  { %1461 = vmatprep.subr.mxu1 %v3208_v52  ;;  %1532 = vmatprep.subr.mxu0 %v3314_v9  ;;  %v2603_v11 = vmul.f32 %v2595_v44, %v2587_v3  ;;  %v4270_v3 = vld [vmem:[#allocation38_spill] sm:$0xff]  ;;  %v4271_v44 = vld [vmem:[#allocation25_spill] sm:$0xff] }
 0x2d4   :  { %1462 = vmatpush1.msra.mxu1 %v3211_v54  ;;  %1533 = vmatpush1.msra.mxu0 %v3318_v13 }
 0x2d5   :  { %1463 = vmatprep.subr.mxu1 %v3214_v56  ;;  %1534 = vmatprep.subr.mxu0 %v3322_v17  ;;  %v2619_v37 = vadd.f32 %v2611_v29, %v2603_v11  ;;  %v4272_v29 = vld [vmem:[#allocation39_spill] sm:$0xff]  ;;  %v4273_v11 = vld [vmem:[#allocation26_spill] sm:$0xff] }
 0x2d6   :  { %1464 = vmatpush1.msra.mxu1 %v3217_v58  ;;  %1535 = vmatpush1.msra.mxu0 %v3326_v39 }
 0x2d7   :  { %1465 = vmatprep.subr.mxu1 %v3220_v60  ;;  %1536 = vmatprep.subr.mxu0 %v3330_v15  ;;  %2627 = vst [vmem:[#allocation14] sm:$0x3] %v2619_v37  ;;  %v4274_v37 = vld [vmem:[#allocation40_spill] sm:$0xff] }
 0x2d8   :  { %1466 = vmatpush1.msra.mxu1 %v3223_v62  ;;  %1537 = vmatpush1.msra.mxu0 %v3334_v20 }
 0x2d9   :  { %1467 = vmatprep.subr.mxu1 %v3226_v6  ;;  %1538 = vmatprep.subr.mxu0 %v3338_v21 }
 0x2da   :  { %1468 = vmatpush1.msra.mxu1 %v3229_v8  ;;  %1539 = vmatpush1.msra.mxu0 %v3342_v4 }
 0x2db   :  { %1469 = vmatprep.subr.mxu1 %v3232_v10  ;;  %1540 = vmatprep.subr.mxu0 %v3346_v23 }
 0x2dc   :  { %1470 = vmatpush1.msra.mxu1 %v3235_v16  ;;  %1541 = vmatpush1.msra.mxu0 %v3350_v40 }
 0x2dd   :  { %1471 = vmatprep.subr.mxu1 %v3238_v14  ;;  %1542 = vmatprep.subr.mxu0 %v3354_v41 }
 0x2de   :  { %1472 = vmatpush1.msra.mxu1 %v4259_v33  ;;  %1543 = vmatpush1.msra.mxu0 %v4260_v49 }
 0x2df   :  { %1473 = vmatprep.subr.mxu1 %v4261_v2  ;;  %1544 = vmatprep.subr.mxu0 %v4262_v24 }
 0x2e0   :  { %1474 = vmatpush1.msra.mxu1 %v4263_v0  ;;  %1545 = vmatpush1.msra.mxu0 %v4264_v31 }
 0x2e1   :  { %1475 = vmatprep.subr.mxu1 %v4265_v53  ;;  %1546 = vmatprep.subr.mxu0 %v4266_v47 }
 0x2e2   :  { %1476 = vmatpush1.msra.mxu1 %v4267_v28  ;;  %1547 = vmatpush1.msra.mxu0 %v4268_v51 }
 0x2e3   :  { %1477 = vmatprep.subr.mxu1 %v4269_v36  ;;  %1548 = vmatprep.subr.mxu0 %v4270_v3 }
 0x2e4   :  { %1478 = vmatpush1.msra.mxu1 %v4271_v44  ;;  %1549 = vmatpush1.msra.mxu0 %v4272_v29  ;;  %v4283_v29 = vld [vmem:[#allocation31_spill] sm:$0xff] }
 0x2e5   :  { %1479 = vmatprep.subr.mxu1 %v4273_v11  ;;  %1550 = vmatprep.subr.mxu0 %v4274_v37  ;;  %v4284_v11 = vmov 0.0   ;;  %v4285_v37 = vld [vmem:[#allocation45_spill] sm:$0xff] }
 0x2e6   :  { %1480 = vmatpush1.msra.mxu1 %v4275_v1  ;;  %1551 = vmatpush1.msra.mxu0 %v4276_v45  ;;  %v3582_v45 = vld [vmem:[#allocation12 + $0x1e8] sm:$0xff] }
 0x2e7   :  { %1481 = vmatprep.subr.mxu1 %v4277_v18  ;;  %1552 = vmatprep.subr.mxu0 %v4278_v25  ;;  %4286 = vst [vmem:[#allocation19_spill] sm:$0xff] %v3582_v45  ;;  %v4287_v25 = vld [vmem:[#allocation32_spill] sm:$0xff] }
 0x2e8   :  { %1482 = vmatpush1.msra.mxu1 %v4279_v22  ;;  %1553 = vmatpush1.msra.mxu0 %v4280_v12 }
 0x2e9   :  { %1483 = vmatprep.subr.mxu1 %v4281_v30  ;;  %1554 = vmatprep.subr.mxu0 %v4282_v27 }
 0x2ea   :  { %1484 = vmatpush1.msra.mxu1 %v4283_v29  ;;  %1517 = vmatprep.mubr.f32.mxu1 %v4284_v11 }
 0x2eb   :  { %1555 = vmatpush1.msra.mxu0 %v4285_v37  ;;  %1588 = vmatprep.mubr.f32.mxu0 %v4284_v11  ;;  %v4288_v37 = vcombine.high %v3471_v42, %v3479_v26 }
 0x2ec   :  { %1642 = vmatprep.subr.mxu1 %v3582_v45  ;;  %1713 = vmatprep.subr.mxu0 %v4287_v25 }
 0x38b   :  { %v1330_v22 = vpop.f32.mrf.mxu1  ;;  %v1401_v12 = vpop.f32.mrf.mxu0 }
 0x38d   :  { %v1332_v18 = vpop.f32.mrf.mxu1  ;;  %v1403_v30 = vpop.f32.mrf.mxu0 }
 0x38e   :  { %v1410_v1 = vcombine.low %v1330_v22, %v1332_v18  ;;  %v1411_v27 = vcombine.low %v1401_v12, %v1403_v30  ;;  %v4305_v18 = vld [vmem:[#allocation44_spill] sm:$0xff] }
 0x390   :  { %v1418_v29 = vrot.slane %v1410_v1, %v3070_v5  ;;  %v1425_v44 = vrot.slane %v1411_v27, %v3070_v5 }
 0x392   :  { %v1426_v3 = vcombine.low %v1418_v29, %v1425_v44 }
 0x394   :  { %v1428_v11 = vadd.f32 %v1426_v3, %v4288_v37 }
 0x396   :  { %v2665_v36 = vmul.f32 -1.442695, %v1428_v11  ;;  %v1436_v25 = vrot.slane %v1428_v11, 6 }
 0x398   :  { %2761 = vpow2.f32 %v2665_v36 }
 0x3a5   :  { %v2762_v45 = vpop.eup %2761 }
 0x3a6   :  { %v1432_v51 = vadd.f32 1.0, %v2762_v45  ;;  %v4302_v45 = vld [vmem:[#allocation29_spill] sm:$0xff] }
 0x3a8   :  { %2763 = vrcp.f32 %v1432_v51 }
 0x3a9   :  { %2765 = vtanh.f32 %v1436_v25  ;;  %v4304_v25 = vld [vmem:[#allocation30_spill] sm:$0xff] }
 0x3b5   :  { %v2764_v28 = vpop.eup %2763 }
 0x3b6   :  { %v1440_v47 = vrot.slane %v2764_v28, 2  ;;  %v2766_v22 = vpop.eup %2765  ;;  %v1446_v27 = vrot.slane %v2764_v28, 4 }
 0x3b7   :  { %v1443_v30 = vmul.f32 %v2766_v22, %v2764_v28 }
 0x3b8   :  { %v1442_v1 = vmul.f32 %v1440_v47, %v3515_v43  ;;  %v4303_v43 = vld [vmem:[#allocation43_spill] sm:$0xff]  ;;  %v4310_v47 = vld [vmem:[#allocation32_spill] sm:$0xff] }
 0x3ba   :  { %v3592_v12 = vadd.f32 %v1443_v30, %v1442_v1  ;;  %v4311_v30 = vld [vmem:[#allocation46_spill] sm:$0xff]  ;;  %v4312_v1 = vld [vmem:[#allocation47_spill] sm:$0xff] }
 0x3bc   :  { %2767 = vtanh.f32 %v3592_v12 }
 0x3c9   :  { %v2768_v42 = vpop.eup %2767 }
 0x3ca   :  { %v1448_v26 = vmul.f32 %v2768_v42, %v1446_v27  ;;  %v4313_v27 = vcombine.low %v4311_v30, %v4312_v1 }
 0x3cc   :  { %1450 = vst [vmem:[#allocation5 + $0x2] sm:$0x3] %v1448_v26  ;;  %1518 = vmatmul.mubr.f32.vlgmr.msra.gmra.mxu1 %v1448_v26  ;;  %1589 = vmatmul.mubr.f32.vlgmr.msra.gmra.mxu0 %v1448_v26 }
 0x3cd   :  { %1643 = vmatpush1.msra.mxu1 %v3179_v19  ;;  %1714 = vmatpush1.msra.mxu0 %v3287_v55 }
 0x3ce   :  { %1644 = vmatprep.subr.mxu1 %v3181_v34  ;;  %1715 = vmatprep.subr.mxu0 %v3290_v57  ;;  %v2596_v34 = vld [vmem:[#allocation3 + $0x2] sm:$0x3] }
 0x3cf   :  { %1645 = vmatpush1.msra.mxu1 %v3185_v35  ;;  %1716 = vmatpush1.msra.mxu0 %v3295_v59  ;;  %v2612_v35 = vld [vmem:[#allocation6 + $0x2] sm:$0x3] }
 0x3d0   :  { %1646 = vmatprep.subr.mxu1 %v3191_v38  ;;  %1717 = vmatprep.subr.mxu0 %v3299_v61 }
 0x3d1   :  { %1647 = vmatpush1.msra.mxu1 %v3198_v46  ;;  %1718 = vmatpush1.msra.mxu0 %v3302_v63 }
 0x3d2   :  { %1648 = vmatprep.subr.mxu1 %v3202_v48  ;;  %1719 = vmatprep.subr.mxu0 %v3306_v7  ;;  %v4289_v48 = vld [vmem:[#allocation36_spill] sm:$0xff] }
 0x3d3   :  { %1649 = vmatpush1.msra.mxu1 %v3205_v50  ;;  %1720 = vmatpush1.msra.mxu0 %v3311_v32  ;;  %v2588_v19 = vld [vmem:[#allocation5 + $0x2] sm:$0x3]  ;;  %v4290_v50 = vld [vmem:[#allocation23_spill] sm:$0xff] }
 0x3d4   :  { %1650 = vmatprep.subr.mxu1 %v3208_v52  ;;  %1721 = vmatprep.subr.mxu0 %v3314_v9  ;;  %v2604_v38 = vmul.f32 %v2596_v34, %v2588_v19  ;;  %v4291_v52 = vld [vmem:[#allocation37_spill] sm:$0xff] }
 0x3d5   :  { %1651 = vmatpush1.msra.mxu1 %v3211_v54  ;;  %1722 = vmatpush1.msra.mxu0 %v3318_v13  ;;  %v4292_v54 = vld [vmem:[#allocation24_spill] sm:$0xff] }
 0x3d6   :  { %1652 = vmatprep.subr.mxu1 %v3214_v56  ;;  %1723 = vmatprep.subr.mxu0 %v3322_v17  ;;  %v2620_v46 = vadd.f32 %v2612_v35, %v2604_v38  ;;  %v4293_v56 = vld [vmem:[#allocation38_spill] sm:$0xff] }
 0x3d7   :  { %1653 = vmatpush1.msra.mxu1 %v3217_v58  ;;  %1724 = vmatpush1.msra.mxu0 %v3326_v39  ;;  %v4294_v58 = vld [vmem:[#allocation25_spill] sm:$0xff] }
 0x3d8   :  { %1654 = vmatprep.subr.mxu1 %v3220_v60  ;;  %1725 = vmatprep.subr.mxu0 %v3330_v15  ;;  %2628 = vst [vmem:[#allocation14 + $0x2] sm:$0x3] %v2620_v46  ;;  %v4295_v60 = vld [vmem:[#allocation39_spill] sm:$0xff] }
 0x3d9   :  { %1655 = vmatpush1.msra.mxu1 %v3223_v62  ;;  %1726 = vmatpush1.msra.mxu0 %v3334_v20  ;;  %v4296_v62 = vld [vmem:[#allocation26_spill] sm:$0xff] }
 0x3da   :  { %1656 = vmatprep.subr.mxu1 %v3226_v6  ;;  %1727 = vmatprep.subr.mxu0 %v3338_v21  ;;  %v4297_v6 = vld [vmem:[#allocation40_spill] sm:$0xff] }
 0x3db   :  { %1657 = vmatpush1.msra.mxu1 %v3229_v8  ;;  %1728 = vmatpush1.msra.mxu0 %v3342_v4  ;;  %v4298_v8 = vld [vmem:[#allocation27_spill] sm:$0xff] }
 0x3dc   :  { %1658 = vmatprep.subr.mxu1 %v3232_v10  ;;  %1729 = vmatprep.subr.mxu0 %v3346_v23  ;;  %v4299_v10 = vld [vmem:[#allocation41_spill] sm:$0xff] }
 0x3dd   :  { %1659 = vmatpush1.msra.mxu1 %v3235_v16  ;;  %1730 = vmatpush1.msra.mxu0 %v3350_v40  ;;  %v4300_v16 = vld [vmem:[#allocation28_spill] sm:$0xff] }
 0x3de   :  { %1660 = vmatprep.subr.mxu1 %v3238_v14  ;;  %1731 = vmatprep.subr.mxu0 %v3354_v41  ;;  %v4301_v14 = vld [vmem:[#allocation42_spill] sm:$0xff] }
 0x3df   :  { %1661 = vmatpush1.msra.mxu1 %v4259_v33  ;;  %1732 = vmatpush1.msra.mxu0 %v4260_v49  ;;  %v4306_v33 = vld [vmem:[#allocation31_spill] sm:$0xff] }
 0x3e0   :  { %1662 = vmatprep.subr.mxu1 %v4261_v2  ;;  %1733 = vmatprep.subr.mxu0 %v4262_v24  ;;  %v4307_v2 = vmov 0.0  }
 0x3e1   :  { %1663 = vmatpush1.msra.mxu1 %v4263_v0  ;;  %1734 = vmatpush1.msra.mxu0 %v4264_v31  ;;  %v4308_v0 = vld [vmem:[#allocation45_spill] sm:$0xff] }
 0x3e2   :  { %1664 = vmatprep.subr.mxu1 %v4265_v53  ;;  %1735 = vmatprep.subr.mxu0 %v4289_v48  ;;  %v4309_v53 = vld [vmem:[#allocation19_spill] sm:$0xff] }
 0x3e3   :  { %1665 = vmatpush1.msra.mxu1 %v4290_v50  ;;  %1736 = vmatpush1.msra.mxu0 %v4291_v52 }
 0x3e4   :  { %1666 = vmatprep.subr.mxu1 %v4292_v54  ;;  %1737 = vmatprep.subr.mxu0 %v4293_v56 }
 0x3e5   :  { %1667 = vmatpush1.msra.mxu1 %v4294_v58  ;;  %1738 = vmatpush1.msra.mxu0 %v4295_v60 }
 0x3e6   :  { %1668 = vmatprep.subr.mxu1 %v4296_v62  ;;  %1739 = vmatprep.subr.mxu0 %v4297_v6 }
 0x3e7   :  { %1669 = vmatpush1.msra.mxu1 %v4298_v8  ;;  %1740 = vmatpush1.msra.mxu0 %v4299_v10 }
 0x3e8   :  { %1670 = vmatprep.subr.mxu1 %v4300_v16  ;;  %1741 = vmatprep.subr.mxu0 %v4301_v14 }
 0x3e9   :  { %1671 = vmatpush1.msra.mxu1 %v4302_v45  ;;  %1742 = vmatpush1.msra.mxu0 %v4303_v43 }
 0x3ea   :  { %1672 = vmatprep.subr.mxu1 %v4304_v25  ;;  %1743 = vmatprep.subr.mxu0 %v4305_v18  ;;  %v3670_v25 = vld [vmem:[#allocation12 + $0x1e0] sm:$0xff] }
 0x3eb   :  { %1673 = vmatpush1.msra.mxu1 %v4306_v33  ;;  %1706 = vmatprep.mubr.f32.mxu1 %v4307_v2  ;;  %v3674_v33 = vld [vmem:[#allocation12 + $0x1c8] sm:$0xff] }
 0x3ec   :  { %1744 = vmatpush1.msra.mxu0 %v4308_v0  ;;  %1777 = vmatprep.mubr.f32.mxu0 %v4307_v2 }
 0x3ed   :  { %1831 = vmatprep.subr.mxu1 %v4309_v53  ;;  %1902 = vmatprep.subr.mxu0 %v4310_v47  ;;  %v3682_v47 = vld [vmem:[#allocation12 + $0x1a8] sm:$0xff] }
 0x48c   :  { %v1519_v28 = vpop.f32.mrf.mxu1  ;;  %v1590_v51 = vpop.f32.mrf.mxu0 }
 0x48e   :  { %v1521_v36 = vpop.f32.mrf.mxu1  ;;  %v1592_v3 = vpop.f32.mrf.mxu0 }
 0x48f   :  { %v1599_v44 = vcombine.low %v1519_v28, %v1521_v36  ;;  %v1600_v29 = vcombine.low %v1590_v51, %v1592_v3  ;;  %v3686_v28 = vld [vmem:[#allocation12 + $0x1a0] sm:$0xff]  ;;  %v2613_v51 = vld [vmem:[#allocation6 + $0x4] sm:$0x3]  ;;  %v3698_v36 = vld [vmem:[#allocation12 + $0x168] sm:$0xff] }
 0x490   :  { %v3702_v3 = vld [vmem:[#allocation12 + $0x160] sm:$0xff] }
 0x491   :  { %v1607_v11 = vrot.slane %v1599_v44, %v3070_v5  ;;  %v1614_v37 = vrot.slane %v1600_v29, %v3070_v5  ;;  %v3710_v44 = vld [vmem:[#allocation12 + $0x140] sm:$0xff] }
 0x492   :  { %v3734_v29 = vld [vmem:[#allocation12 + $0xe0] sm:$0xff] }
 0x493   :  { %v1615_v22 = vcombine.low %v1607_v11, %v1614_v37 }
 0x495   :  { %v1617_v42 = vadd.f32 %v1615_v22, %v4313_v27 }
 0x497   :  { %v2666_v26 = vmul.f32 -1.442695, %v1617_v42  ;;  %v1625_v35 = vrot.slane %v1617_v42, 6 }
 0x499   :  { %2769 = vpow2.f32 %v2666_v26 }
 0x4a6   :  { %v2770_v19 = vpop.eup %2769 }
 0x4a7   :  { %v1621_v34 = vadd.f32 1.0, %v2770_v19 }
 0x4a9   :  { %2771 = vrcp.f32 %v1621_v34 }
 0x4aa   :  { %2773 = vtanh.f32 %v1625_v35 }
 0x4b6   :  { %v2772_v38 = vpop.eup %2771 }
 0x4b7   :  { %v1629_v46 = vrot.slane %v2772_v38, 2  ;;  %v2774_v50 = vpop.eup %2773  ;;  %v1635_v8 = vrot.slane %v2772_v38, 4 }
 0x4b8   :  { %v1632_v54 = vmul.f32 %v2774_v50, %v2772_v38 }
 0x4b9   :  { %v1631_v58 = vmul.f32 %v1629_v46, %v3592_v12  ;;  %v3678_v12 = vld [vmem:[#allocation12 + $0x1c0] sm:$0xff] }
 0x4bb   :  { %v3667_v62 = vadd.f32 %v1632_v54, %v1631_v58 }
 0x4bd   :  { %2775 = vtanh.f32 %v3667_v62 }
 0x4ca   :  { %v2776_v16 = vpop.eup %2775 }
 0x4cb   :  { %v1637_v45 = vmul.f32 %v2776_v16, %v1635_v8 }
 0x4cd   :  { %1639 = vst [vmem:[#allocation5 + $0x4] sm:$0x3] %v1637_v45  ;;  %1707 = vmatmul.mubr.f32.vlgmr.msra.gmra.mxu1 %v1637_v45  ;;  %1778 = vmatmul.mubr.f32.vlgmr.msra.gmra.mxu0 %v1637_v45 }
 0x4ce   :  { %1832 = vmatpush1.msra.mxu1 %v3670_v25  ;;  %1903 = vmatpush1.msra.mxu0 %v3287_v55  ;;  %v3690_v55 = vld [vmem:[#allocation12 + $0x188] sm:$0xff] }
 0x4cf   :  { %1833 = vmatprep.subr.mxu1 %v3674_v33  ;;  %1904 = vmatprep.subr.mxu0 %v3290_v57  ;;  %v3694_v57 = vld [vmem:[#allocation12 + $0x180] sm:$0xff] }
 0x4d0   :  { %1834 = vmatpush1.msra.mxu1 %v3678_v12  ;;  %1905 = vmatpush1.msra.mxu0 %v3295_v59 }
 0x4d1   :  { %1835 = vmatprep.subr.mxu1 %v3682_v47  ;;  %1906 = vmatprep.subr.mxu0 %v3299_v61  ;;  %v2597_v61 = vld [vmem:[#allocation3 + $0x4] sm:$0x3] }
 0x4d2   :  { %1836 = vmatpush1.msra.mxu1 %v3686_v28  ;;  %1907 = vmatpush1.msra.mxu0 %v3302_v63 }
 0x4d3   :  { %1837 = vmatprep.subr.mxu1 %v3690_v55  ;;  %1908 = vmatprep.subr.mxu0 %v3306_v7  ;;  %v3706_v7 = vld [vmem:[#allocation12 + $0x148] sm:$0xff] }
 0x4d4   :  { %1838 = vmatpush1.msra.mxu1 %v3694_v57  ;;  %1909 = vmatpush1.msra.mxu0 %v3311_v32  ;;  %v2589_v59 = vld [vmem:[#allocation5 + $0x4] sm:$0x3] }
 0x4d5   :  { %1839 = vmatprep.subr.mxu1 %v3698_v36  ;;  %1910 = vmatprep.subr.mxu0 %v3314_v9  ;;  %v2605_v63 = vmul.f32 %v2597_v61, %v2589_v59  ;;  %v3714_v9 = vld [vmem:[#allocation12 + $0x128] sm:$0xff]  ;;  %v3810_v61 = vld [vmem:[#allocation12 + $0x1f0] sm:$0xff] }
 0x4d6   :  { %1840 = vmatpush1.msra.mxu1 %v3702_v3  ;;  %1911 = vmatpush1.msra.mxu0 %v3318_v13  ;;  %v3718_v13 = vld [vmem:[#allocation12 + $0x120] sm:$0xff] }
 0x4d7   :  { %1841 = vmatprep.subr.mxu1 %v3706_v7  ;;  %1912 = vmatprep.subr.mxu0 %v3322_v17  ;;  %v2621_v32 = vadd.f32 %v2613_v51, %v2605_v63  ;;  %v3722_v17 = vld [vmem:[#allocation12 + $0x108] sm:$0xff]  ;;  %v3814_v51 = vld [vmem:[#allocation12 + $0x1d8] sm:$0xff] }
 0x4d8   :  { %1842 = vmatpush1.msra.mxu1 %v3710_v44  ;;  %1913 = vmatpush1.msra.mxu0 %v3326_v39  ;;  %v3726_v39 = vld [vmem:[#allocation12 + $0x100] sm:$0xff]  ;;  %v3822_v63 = vld [vmem:[#allocation12 + $0x1b8] sm:$0xff] }
 0x4d9   :  { %1843 = vmatprep.subr.mxu1 %v3714_v9  ;;  %1914 = vmatprep.subr.mxu0 %v3330_v15  ;;  %2629 = vst [vmem:[#allocation14 + $0x4] sm:$0x3] %v2621_v32  ;;  %v3730_v15 = vld [vmem:[#allocation12 + $0xe8] sm:$0xff]  ;;  %v3826_v32 = vld [vmem:[#allocation12 + $0x1b0] sm:$0xff] }
 0x4da   :  { %1844 = vmatpush1.msra.mxu1 %v3718_v13  ;;  %1915 = vmatpush1.msra.mxu0 %v3334_v20  ;;  %v3738_v20 = vld [vmem:[#allocation12 + $0xc8] sm:$0xff] }
 0x4db   :  { %1845 = vmatprep.subr.mxu1 %v3722_v17  ;;  %1916 = vmatprep.subr.mxu0 %v3338_v21  ;;  %v3742_v21 = vld [vmem:[#allocation12 + $0xc0] sm:$0xff] }
 0x4dc   :  { %1846 = vmatpush1.msra.mxu1 %v3726_v39  ;;  %1917 = vmatpush1.msra.mxu0 %v3342_v4  ;;  %v3746_v4 = vld [vmem:[#allocation12 + $0xa8] sm:$0xff] }
 0x4dd   :  { %1847 = vmatprep.subr.mxu1 %v3730_v15  ;;  %1918 = vmatprep.subr.mxu0 %v3346_v23  ;;  %v3750_v23 = vld [vmem:[#allocation12 + $0xa0] sm:$0xff] }
 0x4de   :  { %1848 = vmatpush1.msra.mxu1 %v3734_v29  ;;  %1919 = vmatpush1.msra.mxu0 %v3350_v40  ;;  %v3754_v40 = vld [vmem:[#allocation12 + $0x88] sm:$0xff] }
 0x4df   :  { %1849 = vmatprep.subr.mxu1 %v3738_v20  ;;  %1920 = vmatprep.subr.mxu0 %v3354_v41  ;;  %v3758_v41 = vld [vmem:[#allocation12 + $0x80] sm:$0xff] }
 0x4e0   :  { %1850 = vmatpush1.msra.mxu1 %v3742_v21  ;;  %1921 = vmatpush1.msra.mxu0 %v4260_v49  ;;  %4314 = vst [vmem:[#allocation33_spill] sm:$0xff] %v3758_v41  ;;  %v3762_v49 = vld [vmem:[#allocation12 + $0x68] sm:$0xff] }
 0x4e1   :  { %1851 = vmatprep.subr.mxu1 %v3746_v4  ;;  %1922 = vmatprep.subr.mxu0 %v4262_v24  ;;  %4315 = vst [vmem:[#allocation20_spill] sm:$0xff] %v3762_v49  ;;  %v3766_v24 = vld [vmem:[#allocation12 + $0x60] sm:$0xff] }
 0x4e2   :  { %1852 = vmatpush1.msra.mxu1 %v3750_v23  ;;  %1923 = vmatpush1.msra.mxu0 %v4264_v31  ;;  %4316 = vst [vmem:[#allocation34_spill] sm:$0xff] %v3766_v24  ;;  %v3770_v31 = vld [vmem:[#allocation12 + $0x48] sm:$0xff] }
 0x4e3   :  { %1853 = vmatprep.subr.mxu1 %v3754_v40  ;;  %1924 = vmatprep.subr.mxu0 %v4289_v48  ;;  %4317 = vst [vmem:[#allocation21_spill] sm:$0xff] %v3770_v31  ;;  %v3774_v48 = vld [vmem:[#allocation12 + $0x40] sm:$0xff] }
 0x4e4   :  { %1854 = vmatpush1.msra.mxu1 %v3758_v41  ;;  %1925 = vmatpush1.msra.mxu0 %v4291_v52  ;;  %4318 = vst [vmem:[#allocation35_spill] sm:$0xff] %v3774_v48  ;;  %v3778_v52 = vld [vmem:[#allocation12 + $0x28] sm:$0xff] }
 0x4e5   :  { %1855 = vmatprep.subr.mxu1 %v3762_v49  ;;  %1926 = vmatprep.subr.mxu0 %v4293_v56  ;;  %4319 = vst [vmem:[#allocation22_spill] sm:$0xff] %v3778_v52  ;;  %v3782_v56 = vld [vmem:[#allocation12 + $0x20] sm:$0xff] }
 0x4e6   :  { %1856 = vmatpush1.msra.mxu1 %v3766_v24  ;;  %1927 = vmatpush1.msra.mxu0 %v4295_v60  ;;  %4320 = vst [vmem:[#allocation36_spill] sm:$0xff] %v3782_v56  ;;  %v3786_v60 = vld [vmem:[#allocation12 + $0x8] sm:$0xff] }
 0x4e7   :  { %1857 = vmatprep.subr.mxu1 %v3770_v31  ;;  %1928 = vmatprep.subr.mxu0 %v4297_v6  ;;  %4321 = vst [vmem:[#allocation23_spill] sm:$0xff] %v3786_v60  ;;  %v3790_v6 = vld [vmem:[#allocation12] sm:$0xff] }
 0x4e8   :  { %1858 = vmatpush1.msra.mxu1 %v3774_v48  ;;  %1929 = vmatpush1.msra.mxu0 %v4299_v10  ;;  %4322 = vst [vmem:[#allocation37_spill] sm:$0xff] %v3790_v6  ;;  %v3797_v10 = vld [vmem:[#allocation12 + $0x1f8] sm:$0xff] }
 0x4e9   :  { %1859 = vmatprep.subr.mxu1 %v3778_v52  ;;  %1930 = vmatprep.subr.mxu0 %v4301_v14  ;;  %4323 = vst [vmem:[#allocation24_spill] sm:$0xff] %v3797_v10 }
 0x4ea   :  { %1860 = vmatpush1.msra.mxu1 %v3782_v56  ;;  %1931 = vmatpush1.msra.mxu0 %v4303_v43 }
 0x4eb   :  { %1861 = vmatprep.subr.mxu1 %v3786_v60  ;;  %1932 = vmatprep.subr.mxu0 %v4305_v18 }
 0x4ec   :  { %1862 = vmatpush1.msra.mxu1 %v3790_v6  ;;  %1895 = vmatprep.mubr.f32.mxu1 %v4307_v2 }
 0x4ed   :  { %1933 = vmatpush1.msra.mxu0 %v4308_v0  ;;  %1966 = vmatprep.mubr.f32.mxu0 %v4307_v2  ;;  %v4324_v0 = vcombine.high %v4311_v30, %v4312_v1 }
 0x4ee   :  { %2020 = vmatprep.subr.mxu1 %v4309_v53  ;;  %2091 = vmatprep.subr.mxu0 %v3797_v10 }
 0x58d   :  { %v1708_v14 = vpop.f32.mrf.mxu1  ;;  %v1779_v43 = vpop.f32.mrf.mxu0 }
 0x58f   :  { %v1710_v11 = vpop.f32.mrf.mxu1  ;;  %v1781_v18 = vpop.f32.mrf.mxu0 }
 0x590   :  { %v1788_v37 = vcombine.low %v1708_v14, %v1710_v11  ;;  %v1789_v22 = vcombine.low %v1779_v43, %v1781_v18  ;;  %v3830_v14 = vld [vmem:[#allocation12 + $0x198] sm:$0xff]  ;;  %v3834_v43 = vld [vmem:[#allocation12 + $0x190] sm:$0xff] }
 0x591   :  { %v2598_v18 = vld [vmem:[#allocation3 + $0x6] sm:$0x3] }
 0x592   :  { %v1796_v27 = vrot.slane %v1788_v37, %v3070_v5  ;;  %v1803_v42 = vrot.slane %v1789_v22, %v3070_v5  ;;  %v2614_v37 = vld [vmem:[#allocation6 + $0x6] sm:$0x3]  ;;  %v3838_v22 = vld [vmem:[#allocation12 + $0x178] sm:$0xff] }
 0x594   :  { %v1804_v26 = vcombine.low %v1796_v27, %v1803_v42  ;;  %v3842_v42 = vld [vmem:[#allocation12 + $0x170] sm:$0xff] }
 0x596   :  { %v1806_v19 = vadd.f32 %v1804_v26, %v4324_v0  ;;  %v3846_v26 = vld [vmem:[#allocation12 + $0x158] sm:$0xff] }
 0x598   :  { %v2667_v34 = vmul.f32 -1.442695, %v1806_v19  ;;  %v1814_v46 = vrot.slane %v1806_v19, 6  ;;  %v3850_v19 = vld [vmem:[#allocation12 + $0x150] sm:$0xff] }
 0x59a   :  { %2777 = vpow2.f32 %v2667_v34  ;;  %v3854_v34 = vld [vmem:[#allocation12 + $0x138] sm:$0xff] }
 0x5a7   :  { %v2778_v35 = vpop.eup %2777 }
 0x5a8   :  { %v1810_v38 = vadd.f32 1.0, %v2778_v35  ;;  %v3858_v35 = vld [vmem:[#allocation12 + $0x130] sm:$0xff] }
 0x5aa   :  { %2779 = vrcp.f32 %v1810_v38  ;;  %v3862_v38 = vld [vmem:[#allocation12 + $0x118] sm:$0xff] }
 0x5ab   :  { %2781 = vtanh.f32 %v1814_v46  ;;  %v3866_v46 = vld [vmem:[#allocation12 + $0x110] sm:$0xff] }
 0x5b7   :  { %v2780_v50 = vpop.eup %2779 }
 0x5b8   :  { %v1818_v54 = vrot.slane %v2780_v50, 2  ;;  %v2782_v58 = vpop.eup %2781  ;;  %v1824_v59 = vrot.slane %v2780_v50, 4 }
 0x5b9   :  { %v1821_v8 = vmul.f32 %v2782_v58, %v2780_v50  ;;  %v3870_v50 = vld [vmem:[#allocation12 + $0xf8] sm:$0xff] }
 0x5ba   :  { %v1820_v16 = vmul.f32 %v1818_v54, %v3667_v62  ;;  %v3818_v62 = vld [vmem:[#allocation12 + $0x1d0] sm:$0xff]  ;;  %v3878_v58 = vld [vmem:[#allocation12 + $0xd8] sm:$0xff] }
 0x5bb   :  { %v3874_v54 = vld [vmem:[#allocation12 + $0xf0] sm:$0xff] }
 0x5bc   :  { %v3806_v45 = vadd.f32 %v1821_v8, %v1820_v16  ;;  %v3882_v8 = vld [vmem:[#allocation12 + $0xd0] sm:$0xff]  ;;  %v3886_v16 = vld [vmem:[#allocation12 + $0xb8] sm:$0xff] }
 0x5be   :  { %2783 = vtanh.f32 %v3806_v45 }
 0x5cb   :  { %v2784_v30 = vpop.eup %2783 }
 0x5cc   :  { %v1826_v1 = vmul.f32 %v2784_v30, %v1824_v59  ;;  %v3890_v59 = vld [vmem:[#allocation12 + $0xb0] sm:$0xff]  ;;  %v3894_v30 = vld [vmem:[#allocation12 + $0x98] sm:$0xff] }
 0x5cd   :  { %4325 = vst [vmem:[#allocation38_spill] sm:$0xff] %v3894_v30 }
 0x5ce   :  { %1828 = vst [vmem:[#allocation5 + $0x6] sm:$0x3] %v1826_v1  ;;  %1896 = vmatmul.mubr.f32.vlgmr.msra.gmra.mxu1 %v1826_v1  ;;  %1967 = vmatmul.mubr.f32.vlgmr.msra.gmra.mxu0 %v1826_v1  ;;  %v3898_v1 = vld [vmem:[#allocation12 + $0x90] sm:$0xff] }
 0x5cf   :  { %2021 = vmatpush1.msra.mxu1 %v3670_v25  ;;  %2092 = vmatpush1.msra.mxu0 %v3810_v61  ;;  %4326 = vst [vmem:[#allocation25_spill] sm:$0xff] %v3898_v1 }
 0x5d0   :  { %2022 = vmatprep.subr.mxu1 %v3674_v33  ;;  %2093 = vmatprep.subr.mxu0 %v3814_v51 }
 0x5d1   :  { %2023 = vmatpush1.msra.mxu1 %v3678_v12  ;;  %2094 = vmatpush1.msra.mxu0 %v3818_v62 }
 0x5d2   :  { %2024 = vmatprep.subr.mxu1 %v3682_v47  ;;  %2095 = vmatprep.subr.mxu0 %v3822_v63 }
 0x5d3   :  { %2025 = vmatpush1.msra.mxu1 %v3686_v28  ;;  %2096 = vmatpush1.msra.mxu0 %v3826_v32 }
 0x5d4   :  { %2026 = vmatprep.subr.mxu1 %v3690_v55  ;;  %2097 = vmatprep.subr.mxu0 %v3830_v14 }
 0x5d5   :  { %2027 = vmatpush1.msra.mxu1 %v3694_v57  ;;  %2098 = vmatpush1.msra.mxu0 %v3834_v43  ;;  %v2590_v11 = vld [vmem:[#allocation5 + $0x6] sm:$0x3] }
 0x5d6   :  { %2028 = vmatprep.subr.mxu1 %v3698_v36  ;;  %2099 = vmatprep.subr.mxu0 %v3838_v22  ;;  %v2606_v27 = vmul.f32 %v2598_v18, %v2590_v11  ;;  %v3902_v11 = vld [vmem:[#allocation12 + $0x78] sm:$0xff]  ;;  %v3906_v18 = vld [vmem:[#allocation12 + $0x70] sm:$0xff] }
 0x5d7   :  { %2029 = vmatpush1.msra.mxu1 %v3702_v3  ;;  %2100 = vmatpush1.msra.mxu0 %v3842_v42  ;;  %4327 = vst [vmem:[#allocation39_spill] sm:$0xff] %v3902_v11  ;;  %4328 = vst [vmem:[#allocation26_spill] sm:$0xff] %v3906_v18 }
 0x5d8   :  { %2030 = vmatprep.subr.mxu1 %v3706_v7  ;;  %2101 = vmatprep.subr.mxu0 %v3846_v26  ;;  %v2622_v0 = vadd.f32 %v2614_v37, %v2606_v27  ;;  %v3910_v37 = vld [vmem:[#allocation12 + $0x58] sm:$0xff]  ;;  %v3914_v27 = vld [vmem:[#allocation12 + $0x50] sm:$0xff] }
 0x5d9   :  { %2031 = vmatpush1.msra.mxu1 %v3710_v44  ;;  %2102 = vmatpush1.msra.mxu0 %v3850_v19  ;;  %4329 = vst [vmem:[#allocation40_spill] sm:$0xff] %v3910_v37  ;;  %4330 = vst [vmem:[#allocation27_spill] sm:$0xff] %v3914_v27 }
 0x5da   :  { %2032 = vmatprep.subr.mxu1 %v3714_v9  ;;  %2103 = vmatprep.subr.mxu0 %v3854_v34  ;;  %2630 = vst [vmem:[#allocation14 + $0x6] sm:$0x3] %v2622_v0  ;;  %v3918_v0 = vld [vmem:[#allocation12 + $0x38] sm:$0xff] }
 0x5db   :  { %2033 = vmatpush1.msra.mxu1 %v3718_v13  ;;  %2104 = vmatpush1.msra.mxu0 %v3858_v35  ;;  %4331 = vst [vmem:[#allocation41_spill] sm:$0xff] %v3918_v0 }
 0x5dc   :  { %2034 = vmatprep.subr.mxu1 %v3722_v17  ;;  %2105 = vmatprep.subr.mxu0 %v3862_v38 }
 0x5dd   :  { %2035 = vmatpush1.msra.mxu1 %v3726_v39  ;;  %2106 = vmatpush1.msra.mxu0 %v3866_v46 }
 0x5de   :  { %2036 = vmatprep.subr.mxu1 %v3730_v15  ;;  %2107 = vmatprep.subr.mxu0 %v3870_v50 }
 0x5df   :  { %2037 = vmatpush1.msra.mxu1 %v3734_v29  ;;  %2108 = vmatpush1.msra.mxu0 %v3874_v54 }
 0x5e0   :  { %2038 = vmatprep.subr.mxu1 %v3738_v20  ;;  %2109 = vmatprep.subr.mxu0 %v3878_v58 }
 0x5e1   :  { %2039 = vmatpush1.msra.mxu1 %v3742_v21  ;;  %2110 = vmatpush1.msra.mxu0 %v3882_v8 }
 0x5e2   :  { %2040 = vmatprep.subr.mxu1 %v3746_v4  ;;  %2111 = vmatprep.subr.mxu0 %v3886_v16 }
 0x5e3   :  { %2041 = vmatpush1.msra.mxu1 %v3750_v23  ;;  %2112 = vmatpush1.msra.mxu0 %v3890_v59 }
 0x5e4   :  { %2042 = vmatprep.subr.mxu1 %v3754_v40  ;;  %2113 = vmatprep.subr.mxu0 %v3894_v30 }
 0x5e5   :  { %2043 = vmatpush1.msra.mxu1 %v3758_v41  ;;  %2114 = vmatpush1.msra.mxu0 %v3898_v1 }
 0x5e6   :  { %2044 = vmatprep.subr.mxu1 %v3762_v49  ;;  %2115 = vmatprep.subr.mxu0 %v3902_v11  ;;  %v4336_v11 = vld [vmem:[#allocation50_spill] sm:$0xff] }
 0x5e7   :  { %2045 = vmatpush1.msra.mxu1 %v3766_v24  ;;  %2116 = vmatpush1.msra.mxu0 %v3906_v18  ;;  %v3922_v18 = vld [vmem:[#allocation12 + $0x30] sm:$0xff]  ;;  %v4335_v24 = vld [vmem:[#allocation48_spill] sm:$0xff] }
 0x5e8   :  { %2046 = vmatprep.subr.mxu1 %v3770_v31  ;;  %2117 = vmatprep.subr.mxu0 %v3910_v37  ;;  %4332 = vst [vmem:[#allocation28_spill] sm:$0xff] %v3922_v18  ;;  %v3926_v37 = vld [vmem:[#allocation12 + $0x18] sm:$0xff] }
 0x5e9   :  { %2047 = vmatpush1.msra.mxu1 %v3774_v48  ;;  %2118 = vmatpush1.msra.mxu0 %v3914_v27  ;;  %4333 = vst [vmem:[#allocation42_spill] sm:$0xff] %v3926_v37 }
 0x5ea   :  { %2048 = vmatprep.subr.mxu1 %v3778_v52  ;;  %2119 = vmatprep.subr.mxu0 %v3918_v0  ;;  %v3931_v52 = vld [vmem:[#allocation12 + $0x10] sm:$0xff] }
 0x5eb   :  { %2049 = vmatpush1.msra.mxu1 %v3782_v56  ;;  %2120 = vmatpush1.msra.mxu0 %v3922_v18  ;;  %4334 = vst [vmem:[#allocation29_spill] sm:$0xff] %v3931_v52 }
 0x5ec   :  { %2050 = vmatprep.subr.mxu1 %v3786_v60  ;;  %2121 = vmatprep.subr.mxu0 %v3926_v37 }
 0x5ed   :  { %2051 = vmatpush1.msra.mxu1 %v3790_v6  ;;  %2084 = vmatprep.mubr.f32.mxu1 %v4307_v2 }
 0x5ee   :  { %2122 = vmatpush1.msra.mxu0 %v3931_v52  ;;  %2155 = vmatprep.mubr.f32.mxu0 %v4307_v2  ;;  %v4337_v52 = vcombine.low %v4335_v24, %v4336_v11 }
 0x5ef   :  { %2209 = vmatprep.subr.mxu1 %v4309_v53  ;;  %2280 = vmatprep.subr.mxu0 %v3797_v10 }
 0x68e   :  { %v1897_v18 = vpop.f32.mrf.mxu1  ;;  %v1968_v60 = vpop.f32.mrf.mxu0 }
 0x690   :  { %v1899_v56 = vpop.f32.mrf.mxu1  ;;  %v1970_v0 = vpop.f32.mrf.mxu0 }
 0x691   :  { %v1977_v27 = vcombine.low %v1897_v18, %v1899_v56  ;;  %v1978_v37 = vcombine.low %v1968_v60, %v1970_v0  ;;  %v4343_v0 = vld [vmem:[#allocation34_spill] sm:$0xff] }
 0x693   :  { %v1985_v6 = vrot.slane %v1977_v27, %v3070_v5  ;;  %v1992_v48 = vrot.slane %v1978_v37, %v3070_v5  ;;  %v4342_v37 = vld [vmem:[#allocation39_spill] sm:$0xff] }
 0x695   :  { %v1993_v31 = vcombine.low %v1985_v6, %v1992_v48 }
 0x697   :  { %v1995_v49 = vadd.f32 %v1993_v31, %v4337_v52 }
 0x699   :  { %v2668_v2 = vmul.f32 -1.442695, %v1995_v49  ;;  %v2003_v10 = vrot.slane %v1995_v49, 6 }
 0x69b   :  { %2785 = vpow2.f32 %v2668_v2 }
 0x6a8   :  { %v2786_v53 = vpop.eup %2785 }
 0x6a9   :  { %v1999_v1 = vadd.f32 1.0, %v2786_v53  ;;  %v2599_v53 = vld [vmem:[#allocation3 + $0x8] sm:$0x3] }
 0x6ab   :  { %2787 = vrcp.f32 %v1999_v1  ;;  %v4341_v1 = vld [vmem:[#allocation20_spill] sm:$0xff] }
 0x6ac   :  { %2789 = vtanh.f32 %v2003_v10  ;;  %v4338_v10 = vld [vmem:[#allocation38_spill] sm:$0xff] }
 0x6b8   :  { %v2788_v41 = vpop.eup %2787 }
 0x6b9   :  { %v2007_v30 = vrot.slane %v2788_v41, 2  ;;  %v2790_v56 = vpop.eup %2789  ;;  %v2013_v48 = vrot.slane %v2788_v41, 4 }
 0x6ba   :  { %v2010_v60 = vmul.f32 %v2790_v56, %v2788_v41  ;;  %v2615_v41 = vld [vmem:[#allocation6 + $0x8] sm:$0x3]  ;;  %v4344_v56 = vld [vmem:[#allocation26_spill] sm:$0xff] }
 0x6bb   :  { %v2009_v18 = vmul.f32 %v2007_v30, %v3806_v45  ;;  %v4339_v45 = vld [vmem:[#allocation33_spill] sm:$0xff] }
 0x6bc   :  { %v4340_v30 = vld [vmem:[#allocation25_spill] sm:$0xff] }
 0x6bd   :  { %v3943_v27 = vadd.f32 %v2010_v60, %v2009_v18  ;;  %v4345_v60 = vld [vmem:[#allocation21_spill] sm:$0xff]  ;;  %v4346_v18 = vld [vmem:[#allocation40_spill] sm:$0xff] }
 0x6bf   :  { %2791 = vtanh.f32 %v3943_v27 }
 0x6cc   :  { %v2792_v6 = vpop.eup %2791 }
 0x6cd   :  { %v2015_v31 = vmul.f32 %v2792_v6, %v2013_v48  ;;  %v4347_v48 = vld [vmem:[#allocation35_spill] sm:$0xff] }
 0x6ce   :  { %v4348_v6 = vld [vmem:[#allocation27_spill] sm:$0xff] }
 0x6cf   :  { %2017 = vst [vmem:[#allocation5 + $0x8] sm:$0x3] %v2015_v31  ;;  %2085 = vmatmul.mubr.f32.vlgmr.msra.gmra.mxu1 %v2015_v31  ;;  %2156 = vmatmul.mubr.f32.vlgmr.msra.gmra.mxu0 %v2015_v31  ;;  %v4349_v31 = vld [vmem:[#allocation22_spill] sm:$0xff] }
 0x6d0   :  { %2210 = vmatpush1.msra.mxu1 %v3670_v25  ;;  %2281 = vmatpush1.msra.mxu0 %v3810_v61 }
 0x6d1   :  { %2211 = vmatprep.subr.mxu1 %v3674_v33  ;;  %2282 = vmatprep.subr.mxu0 %v3814_v51 }
 0x6d2   :  { %2212 = vmatpush1.msra.mxu1 %v3678_v12  ;;  %2283 = vmatpush1.msra.mxu0 %v3818_v62 }
 0x6d3   :  { %2213 = vmatprep.subr.mxu1 %v3682_v47  ;;  %2284 = vmatprep.subr.mxu0 %v3822_v63 }
 0x6d4   :  { %2214 = vmatpush1.msra.mxu1 %v3686_v28  ;;  %2285 = vmatpush1.msra.mxu0 %v3826_v32 }
 0x6d5   :  { %2215 = vmatprep.subr.mxu1 %v3690_v55  ;;  %2286 = vmatprep.subr.mxu0 %v3830_v14 }
 0x6d6   :  { %2216 = vmatpush1.msra.mxu1 %v3694_v57  ;;  %2287 = vmatpush1.msra.mxu0 %v3834_v43  ;;  %v2591_v2 = vld [vmem:[#allocation5 + $0x8] sm:$0x3] }
 0x6d7   :  { %2217 = vmatprep.subr.mxu1 %v3698_v36  ;;  %2288 = vmatprep.subr.mxu0 %v3838_v22  ;;  %v2607_v49 = vmul.f32 %v2599_v53, %v2591_v2  ;;  %v4350_v2 = vld [vmem:[#allocation41_spill] sm:$0xff]  ;;  %v4351_v53 = vld [vmem:[#allocation36_spill] sm:$0xff] }
 0x6d8   :  { %2218 = vmatpush1.msra.mxu1 %v3702_v3  ;;  %2289 = vmatpush1.msra.mxu0 %v3842_v42 }
 0x6d9   :  { %2219 = vmatprep.subr.mxu1 %v3706_v7  ;;  %2290 = vmatprep.subr.mxu0 %v3846_v26  ;;  %v2623_v52 = vadd.f32 %v2615_v41, %v2607_v49  ;;  %v4352_v41 = vld [vmem:[#allocation28_spill] sm:$0xff]  ;;  %v4353_v49 = vld [vmem:[#allocation23_spill] sm:$0xff] }
 0x6da   :  { %2220 = vmatpush1.msra.mxu1 %v3710_v44  ;;  %2291 = vmatpush1.msra.mxu0 %v3850_v19 }
 0x6db   :  { %2221 = vmatprep.subr.mxu1 %v3714_v9  ;;  %2292 = vmatprep.subr.mxu0 %v3854_v34  ;;  %2631 = vst [vmem:[#allocation14 + $0x8] sm:$0x3] %v2623_v52  ;;  %v4354_v52 = vld [vmem:[#allocation42_spill] sm:$0xff] }
 0x6dc   :  { %2222 = vmatpush1.msra.mxu1 %v3718_v13  ;;  %2293 = vmatpush1.msra.mxu0 %v3858_v35 }
 0x6dd   :  { %2223 = vmatprep.subr.mxu1 %v3722_v17  ;;  %2294 = vmatprep.subr.mxu0 %v3862_v38 }
 0x6de   :  { %2224 = vmatpush1.msra.mxu1 %v3726_v39  ;;  %2295 = vmatpush1.msra.mxu0 %v3866_v46 }
 0x6df   :  { %2225 = vmatprep.subr.mxu1 %v3730_v15  ;;  %2296 = vmatprep.subr.mxu0 %v3870_v50 }
 0x6e0   :  { %2226 = vmatpush1.msra.mxu1 %v3734_v29  ;;  %2297 = vmatpush1.msra.mxu0 %v3874_v54 }
 0x6e1   :  { %2227 = vmatprep.subr.mxu1 %v3738_v20  ;;  %2298 = vmatprep.subr.mxu0 %v3878_v58 }
 0x6e2   :  { %2228 = vmatpush1.msra.mxu1 %v3742_v21  ;;  %2299 = vmatpush1.msra.mxu0 %v3882_v8 }
 0x6e3   :  { %2229 = vmatprep.subr.mxu1 %v3746_v4  ;;  %2300 = vmatprep.subr.mxu0 %v3886_v16 }
 0x6e4   :  { %2230 = vmatpush1.msra.mxu1 %v3750_v23  ;;  %2301 = vmatpush1.msra.mxu0 %v3890_v59 }
 0x6e5   :  { %2231 = vmatprep.subr.mxu1 %v3754_v40  ;;  %2302 = vmatprep.subr.mxu0 %v4338_v10 }
 0x6e6   :  { %2232 = vmatpush1.msra.mxu1 %v4339_v45  ;;  %2303 = vmatpush1.msra.mxu0 %v4340_v30 }
 0x6e7   :  { %2233 = vmatprep.subr.mxu1 %v4341_v1  ;;  %2304 = vmatprep.subr.mxu0 %v4342_v37 }
 0x6e8   :  { %2234 = vmatpush1.msra.mxu1 %v4343_v0  ;;  %2305 = vmatpush1.msra.mxu0 %v4344_v56  ;;  %v4355_v56 = vld [vmem:[#allocation37_spill] sm:$0xff] }
 0x6e9   :  { %2235 = vmatprep.subr.mxu1 %v4345_v60  ;;  %2306 = vmatprep.subr.mxu0 %v4346_v18  ;;  %v4356_v60 = vmov 0.0   ;;  %v4357_v18 = vld [vmem:[#allocation29_spill] sm:$0xff] }
 0x6ea   :  { %2236 = vmatpush1.msra.mxu1 %v4347_v48  ;;  %2307 = vmatpush1.msra.mxu0 %v4348_v6  ;;  %v4358_v6 = vld [vmem:[#allocation19_spill] sm:$0xff] }
 0x6eb   :  { %2237 = vmatprep.subr.mxu1 %v4349_v31  ;;  %2308 = vmatprep.subr.mxu0 %v4350_v2  ;;  %v4359_v31 = vld [vmem:[#allocation24_spill] sm:$0xff] }
 0x6ec   :  { %2238 = vmatpush1.msra.mxu1 %v4351_v53  ;;  %2309 = vmatpush1.msra.mxu0 %v4352_v41 }
 0x6ed   :  { %2239 = vmatprep.subr.mxu1 %v4353_v49  ;;  %2310 = vmatprep.subr.mxu0 %v4354_v52 }
 0x6ee   :  { %2240 = vmatpush1.msra.mxu1 %v4355_v56  ;;  %2273 = vmatprep.mubr.f32.mxu1 %v4356_v60 }
 0x6ef   :  { %2311 = vmatpush1.msra.mxu0 %v4357_v18  ;;  %2344 = vmatprep.mubr.f32.mxu0 %v4356_v60  ;;  %v4360_v18 = vcombine.high %v4335_v24, %v4336_v11 }
 0x6f0   :  { %2398 = vmatprep.subr.mxu1 %v4358_v6  ;;  %2469 = vmatprep.subr.mxu0 %v4359_v31 }
 0x78f   :  { %v2086_v2 = vpop.f32.mrf.mxu1  ;;  %v2157_v53 = vpop.f32.mrf.mxu0 }
 0x791   :  { %v2088_v48 = vpop.f32.mrf.mxu1  ;;  %v2159_v41 = vpop.f32.mrf.mxu0 }
 0x792   :  { %v2166_v0 = vcombine.low %v2086_v2, %v2088_v48  ;;  %v2167_v49 = vcombine.low %v2157_v53, %v2159_v41 }
 0x794   :  { %v2174_v52 = vrot.slane %v2166_v0, %v3070_v5  ;;  %v2181_v56 = vrot.slane %v2167_v49, %v3070_v5  ;;  %v2601_v49 = vld [vmem:[#allocation3 + $0xc] sm:$0x3] }
 0x796   :  { %v2182_v37 = vcombine.low %v2174_v52, %v2181_v56  ;;  %v2617_v52 = vld [vmem:[#allocation6 + $0xc] sm:$0x3] }
 0x798   :  { %v2184_v1 = vadd.f32 %v2182_v37, %v4360_v18 }
 0x79a   :  { %v2669_v60 = vmul.f32 -1.442695, %v2184_v1  ;;  %v2192_v31 = vrot.slane %v2184_v1, 6 }
 0x79c   :  { %2793 = vpow2.f32 %v2669_v60 }
 0x7a9   :  { %v2794_v6 = vpop.eup %2793 }
 0x7aa   :  { %v2188_v30 = vadd.f32 1.0, %v2794_v6 }
 0x7ac   :  { %2795 = vrcp.f32 %v2188_v30 }
 0x7ad   :  { %2797 = vtanh.f32 %v2192_v31 }
 0x7b9   :  { %v2796_v45 = vpop.eup %2795 }
 0x7ba   :  { %v2196_v10 = vrot.slane %v2796_v45, 2  ;;  %v2798_v48 = vpop.eup %2797  ;;  %v2202_v56 = vrot.slane %v2796_v45, 4 }
 0x7bb   :  { %v2199_v2 = vmul.f32 %v2798_v48, %v2796_v45 }
 0x7bc   :  { %v2198_v0 = vmul.f32 %v2196_v10, %v3943_v27 }
 0x7be   :  { %v4018_v53 = vadd.f32 %v2199_v2, %v2198_v0 }
 0x7c0   :  { %2799 = vtanh.f32 %v4018_v53 }
 0x7cd   :  { %v2800_v24 = vpop.eup %2799 }
 0x7ce   :  { %v2204_v11 = vmul.f32 %v2800_v24, %v2202_v56 }
 0x7d0   :  { %2206 = vst [vmem:[#allocation5 + $0xa] sm:$0x3] %v2204_v11  ;;  %2274 = vmatmul.mubr.f32.vlgmr.msra.gmra.mxu1 %v2204_v11  ;;  %2345 = vmatmul.mubr.f32.vlgmr.msra.gmra.mxu0 %v2204_v11 }
 0x7d1   :  { %2399 = vmatpush1.msra.mxu1 %v3670_v25  ;;  %2470 = vmatpush1.msra.mxu0 %v3810_v61  ;;  %v4378_v61 = vld [vmem:[#allocation37_spill] sm:$0xff] }
 0x7d2   :  { %2400 = vmatprep.subr.mxu1 %v3674_v33  ;;  %2471 = vmatprep.subr.mxu0 %v3814_v51  ;;  %v2600_v33 = vld [vmem:[#allocation3 + $0xa] sm:$0x3]  ;;  %v4379_v51 = vmov 0.0  }
 0x7d3   :  { %2401 = vmatpush1.msra.mxu1 %v3678_v12  ;;  %2472 = vmatpush1.msra.mxu0 %v3818_v62  ;;  %v2616_v12 = vld [vmem:[#allocation6 + $0xa] sm:$0x3]  ;;  %v4380_v62 = vld [vmem:[#allocation29_spill] sm:$0xff] }
 0x7d4   :  { %2402 = vmatprep.subr.mxu1 %v3682_v47  ;;  %2473 = vmatprep.subr.mxu0 %v3822_v63 }
 0x7d5   :  { %2403 = vmatpush1.msra.mxu1 %v3686_v28  ;;  %2474 = vmatpush1.msra.mxu0 %v3826_v32 }
 0x7d6   :  { %2404 = vmatprep.subr.mxu1 %v3690_v55  ;;  %2475 = vmatprep.subr.mxu0 %v3830_v14  ;;  %v4361_v55 = vld [vmem:[#allocation38_spill] sm:$0xff] }
 0x7d7   :  { %2405 = vmatpush1.msra.mxu1 %v3694_v57  ;;  %2476 = vmatpush1.msra.mxu0 %v3834_v43  ;;  %v2592_v25 = vld [vmem:[#allocation5 + $0xa] sm:$0x3]  ;;  %v4362_v57 = vld [vmem:[#allocation33_spill] sm:$0xff] }
 0x7d8   :  { %2406 = vmatprep.subr.mxu1 %v3698_v36  ;;  %2477 = vmatprep.subr.mxu0 %v3838_v22  ;;  %v2608_v47 = vmul.f32 %v2600_v33, %v2592_v25  ;;  %v4363_v36 = vld [vmem:[#allocation25_spill] sm:$0xff] }
 0x7d9   :  { %2407 = vmatpush1.msra.mxu1 %v3702_v3  ;;  %2478 = vmatpush1.msra.mxu0 %v3842_v42  ;;  %v4364_v3 = vld [vmem:[#allocation20_spill] sm:$0xff] }
 0x7da   :  { %2408 = vmatprep.subr.mxu1 %v3706_v7  ;;  %2479 = vmatprep.subr.mxu0 %v3846_v26  ;;  %v2624_v28 = vadd.f32 %v2616_v12, %v2608_v47  ;;  %v4365_v7 = vld [vmem:[#allocation39_spill] sm:$0xff] }
 0x7db   :  { %2409 = vmatpush1.msra.mxu1 %v3710_v44  ;;  %2480 = vmatpush1.msra.mxu0 %v3850_v19  ;;  %v4366_v44 = vld [vmem:[#allocation34_spill] sm:$0xff] }
 0x7dc   :  { %2410 = vmatprep.subr.mxu1 %v3714_v9  ;;  %2481 = vmatprep.subr.mxu0 %v3854_v34  ;;  %2632 = vst [vmem:[#allocation14 + $0xa] sm:$0x3] %v2624_v28  ;;  %v4367_v9 = vld [vmem:[#allocation26_spill] sm:$0xff] }
 0x7dd   :  { %2411 = vmatpush1.msra.mxu1 %v3718_v13  ;;  %2482 = vmatpush1.msra.mxu0 %v3858_v35  ;;  %v4368_v13 = vld [vmem:[#allocation21_spill] sm:$0xff] }
 0x7de   :  { %2412 = vmatprep.subr.mxu1 %v3722_v17  ;;  %2483 = vmatprep.subr.mxu0 %v3862_v38  ;;  %v4369_v17 = vld [vmem:[#allocation40_spill] sm:$0xff]  ;;  %v4381_v35 = vld [vmem:[#allocation49_spill] sm:$0xff]  ;;  %v4382_v38 = vld [vmem:[#allocation51_spill] sm:$0xff] }
 0x7df   :  { %2413 = vmatpush1.msra.mxu1 %v3726_v39  ;;  %2484 = vmatpush1.msra.mxu0 %v3866_v46  ;;  %v4370_v39 = vld [vmem:[#allocation35_spill] sm:$0xff]  ;;  %v4383_v46 = vcombine.low %v4381_v35, %v4382_v38  ;;  %v4384_v12 = vcombine.high %v4381_v35, %v4382_v38 }
 0x7e0   :  { %2414 = vmatprep.subr.mxu1 %v3730_v15  ;;  %2485 = vmatprep.subr.mxu0 %v3870_v50  ;;  %v4371_v15 = vld [vmem:[#allocation27_spill] sm:$0xff] }
 0x7e1   :  { %2415 = vmatpush1.msra.mxu1 %v3734_v29  ;;  %2486 = vmatpush1.msra.mxu0 %v3874_v54  ;;  %v4372_v29 = vld [vmem:[#allocation22_spill] sm:$0xff] }
 0x7e2   :  { %2416 = vmatprep.subr.mxu1 %v3738_v20  ;;  %2487 = vmatprep.subr.mxu0 %v3878_v58  ;;  %v4373_v20 = vld [vmem:[#allocation41_spill] sm:$0xff] }
 0x7e3   :  { %2417 = vmatpush1.msra.mxu1 %v3742_v21  ;;  %2488 = vmatpush1.msra.mxu0 %v3882_v8  ;;  %v4374_v21 = vld [vmem:[#allocation36_spill] sm:$0xff] }
 0x7e4   :  { %2418 = vmatprep.subr.mxu1 %v3746_v4  ;;  %2489 = vmatprep.subr.mxu0 %v3886_v16  ;;  %v4375_v4 = vld [vmem:[#allocation28_spill] sm:$0xff] }
 0x7e5   :  { %2419 = vmatpush1.msra.mxu1 %v3750_v23  ;;  %2490 = vmatpush1.msra.mxu0 %v3890_v59  ;;  %v4376_v23 = vld [vmem:[#allocation23_spill] sm:$0xff] }
 0x7e6   :  { %2420 = vmatprep.subr.mxu1 %v3754_v40  ;;  %2491 = vmatprep.subr.mxu0 %v4361_v55  ;;  %v4377_v40 = vld [vmem:[#allocation42_spill] sm:$0xff] }
 0x7e7   :  { %2421 = vmatpush1.msra.mxu1 %v4362_v57  ;;  %2492 = vmatpush1.msra.mxu0 %v4363_v36 }
 0x7e8   :  { %2422 = vmatprep.subr.mxu1 %v4364_v3  ;;  %2493 = vmatprep.subr.mxu0 %v4365_v7 }
 0x7e9   :  { %2423 = vmatpush1.msra.mxu1 %v4366_v44  ;;  %2494 = vmatpush1.msra.mxu0 %v4367_v9 }
 0x7ea   :  { %2424 = vmatprep.subr.mxu1 %v4368_v13  ;;  %2495 = vmatprep.subr.mxu0 %v4369_v17 }
 0x7eb   :  { %2425 = vmatpush1.msra.mxu1 %v4370_v39  ;;  %2496 = vmatpush1.msra.mxu0 %v4371_v15 }
 0x7ec   :  { %2426 = vmatprep.subr.mxu1 %v4372_v29  ;;  %2497 = vmatprep.subr.mxu0 %v4373_v20  ;;  %v2602_v29 = vld [vmem:[#allocation3 + $0xe] sm:$0x3] }
 0x7ed   :  { %2427 = vmatpush1.msra.mxu1 %v4374_v21  ;;  %2498 = vmatpush1.msra.mxu0 %v4375_v4  ;;  %v2618_v21 = vld [vmem:[#allocation6 + $0xe] sm:$0x3] }
 0x7ee   :  { %2428 = vmatprep.subr.mxu1 %v4376_v23  ;;  %2499 = vmatprep.subr.mxu0 %v4377_v40 }
 0x7ef   :  { %2429 = vmatpush1.msra.mxu1 %v4378_v61  ;;  %2462 = vmatprep.mubr.f32.mxu1 %v4379_v51 }
 0x7f0   :  { %2500 = vmatpush1.msra.mxu0 %v4380_v62  ;;  %2533 = vmatprep.mubr.f32.mxu0 %v4379_v51 }
 0x890   :  { %v2275_v63 = vpop.f32.mrf.mxu1  ;;  %v2346_v32 = vpop.f32.mrf.mxu0 }
 0x892   :  { %v2277_v14 = vpop.f32.mrf.mxu1  ;;  %v2348_v43 = vpop.f32.mrf.mxu0 }
 0x893   :  { %v2355_v22 = vcombine.low %v2275_v63, %v2277_v14  ;;  %v2356_v42 = vcombine.low %v2346_v32, %v2348_v43 }
 0x895   :  { %v2363_v26 = vrot.slane %v2355_v22, %v3070_v5  ;;  %v2370_v19 = vrot.slane %v2356_v42, %v3070_v5 }
 0x897   :  { %v2371_v34 = vcombine.low %v2363_v26, %v2370_v19 }
 0x899   :  { %v2373_v50 = vadd.f32 %v2371_v34, %v4383_v46 }
 0x89b   :  { %v2670_v54 = vmul.f32 -1.442695, %v2373_v50  ;;  %v2381_v16 = vrot.slane %v2373_v50, 6 }
 0x89d   :  { %2801 = vpow2.f32 %v2670_v54 }
 0x8aa   :  { %v2802_v58 = vpop.eup %2801 }
 0x8ab   :  { %v2377_v8 = vadd.f32 1.0, %v2802_v58 }
 0x8ad   :  { %2803 = vrcp.f32 %v2377_v8 }
 0x8ae   :  { %2805 = vtanh.f32 %v2381_v16 }
 0x8ba   :  { %v2804_v59 = vpop.eup %2803 }
 0x8bb   :  { %v2385_v27 = vrot.slane %v2804_v59, 2  ;;  %v2806_v10 = vpop.eup %2805  ;;  %v2391_v37 = vrot.slane %v2804_v59, 4 }
 0x8bc   :  { %v2388_v45 = vmul.f32 %v2806_v10, %v2804_v59 }
 0x8bd   :  { %v2387_v30 = vmul.f32 %v2385_v27, %v4018_v53 }
 0x8bf   :  { %v2389_v1 = vadd.f32 %v2388_v45, %v2387_v30 }
 0x8c1   :  { %2807 = vtanh.f32 %v2389_v1 }
 0x8ce   :  { %v2808_v60 = vpop.eup %2807 }
 0x8cf   :  { %v2393_v18 = vmul.f32 %v2808_v60, %v2391_v37 }
 0x8d1   :  { %2395 = vst [vmem:[#allocation5 + $0xc] sm:$0x3] %v2393_v18  ;;  %2463 = vmatmul.mubr.f32.vlgmr.msra.gmra.mxu1 %v2393_v18  ;;  %2534 = vmatmul.mubr.f32.vlgmr.msra.gmra.mxu0 %v2393_v18 }
 0x8d8   :  { %v2593_v41 = vld [vmem:[#allocation5 + $0xc] sm:$0x3] }
 0x8d9   :  { %v2609_v6 = vmul.f32 %v2601_v49, %v2593_v41 }
 0x8db   :  { %v2625_v31 = vadd.f32 %v2617_v52, %v2609_v6 }
 0x8dd   :  { %2633 = vst [vmem:[#allocation14 + $0xc] sm:$0x3] %v2625_v31 }
 0x991   :  { %v2464_v48 = vpop.f32.mrf.mxu1  ;;  %v2535_v2 = vpop.f32.mrf.mxu0 }
 0x993   :  { %v2466_v0 = vpop.f32.mrf.mxu1  ;;  %v2537_v56 = vpop.f32.mrf.mxu0 }
 0x994   :  { %v2544_v24 = vcombine.low %v2464_v48, %v2466_v0  ;;  %v2545_v53 = vcombine.low %v2535_v2, %v2537_v56 }
 0x996   :  { %v2552_v11 = vrot.slane %v2544_v24, %v3070_v5  ;;  %v2559_v25 = vrot.slane %v2545_v53, %v3070_v5 }
 0x998   :  { %v2560_v33 = vcombine.low %v2552_v11, %v2559_v25 }
 0x99a   :  { %v2562_v47 = vadd.f32 %v2560_v33, %v4384_v12 }
 0x99c   :  { %v2671_v28 = vmul.f32 -1.442695, %v2562_v47  ;;  %v2570_v36 = vrot.slane %v2562_v47, 6 }
 0x99e   :  { %2809 = vpow2.f32 %v2671_v28 }
 0x9ab   :  { %v2810_v55 = vpop.eup %2809 }
 0x9ac   :  { %v2566_v57 = vadd.f32 1.0, %v2810_v55 }
 0x9ae   :  { %2811 = vrcp.f32 %v2566_v57 }
 0x9af   :  { %2813 = vtanh.f32 %v2570_v36 }
 0x9bb   :  { %v2812_v3 = vpop.eup %2811 }
 0x9bc   :  { %v2574_v7 = vrot.slane %v2812_v3, 2  ;;  %v2814_v44 = vpop.eup %2813  ;;  %v2580_v5 = vrot.slane %v2812_v3, 4 }
 0x9bd   :  { %v2577_v13 = vmul.f32 %v2814_v44, %v2812_v3 }
 0x9be   :  { %v2576_v9 = vmul.f32 %v2574_v7, %v2389_v1 }
 0x9c0   :  { %v2578_v17 = vadd.f32 %v2577_v13, %v2576_v9 }
 0x9c2   :  { %2815 = vtanh.f32 %v2578_v17  ;;  %2586 = vst [vmem:[#allocation2 + $0x2] sm:$0x3] %v2578_v17 }
 0x9cf   :  { %v2816_v39 = vpop.eup %2815 }
 0x9d0   :  { %v2582_v15 = vmul.f32 %v2816_v39, %v2580_v5 }
 0x9d2   :  { %2584 = vst [vmem:[#allocation5 + $0xe] sm:$0x3] %v2582_v15  ;;  %2585 = vst [vmem:[#allocation2] sm:$0x3] %v2582_v15 }
 0x9d9   :  { %v2594_v20 = vld [vmem:[#allocation5 + $0xe] sm:$0x3] }
 0x9da   :  { %v2610_v4 = vmul.f32 %v2602_v29, %v2594_v20 }
 0x9dc   :  { %v2626_v23 = vadd.f32 %v2618_v21, %v2610_v4 }
 0x9de   :  { %2634 = vst [vmem:[#allocation14 + $0xe] sm:$0x3] %v2626_v23 }
 0x9df   :  { %2972 = shalt.err (!%p2969_p10)
}
 0x9e0   :  { %2646 = dma.vmem_to_hbm [thread:$0]  %s2641_s6, 256, %s4110_s8, [#allocation8], %s2993_s15, %s2993_s15, %s2994_s16  }
 0x9e1   :  { %2987 = dma.done.wait [#allocation8], 256  }
 0x9e2   :  { %2988 = vsyncadd [#allocation8], 4294967040 }
 0x9e3   :  { %2650 = vsyncpa [#allocation7], 1 }
 0x9e4   :  { %2651 = vsyncpa [#allocation10], 1 }
 0x9e5   :  { %2652 = vsyncpa [#allocation13], 1 }
 0x9e6   :  { %2653 = vsyncpa [#allocation8], 1 }

</bundles_post_ra>
